<compile_context>
chip_gen: v7x
topology: tpu7x:2x2x1
jax: 0.10.0
libtpu: 0.0.40
codegen_flags: <defaults>
</compile_context>

<pallas_src>
import functools

import jax
import jax.numpy as jnp
from jax import lax
from jax.experimental import pallas as pl
from jax.experimental.pallas import tpu as pltpu


def _frelu_kernel(w_ref, x_ref, o_ref, *, H, W):
    """FReLU on one channels-last, spatially-flattened block.

    w_ref : (10, TC) f32  -- rows 0..8: BN-scale-folded 3x3 taps, row-major
                             (k = (dy+1)*3 + (dx+1)); row 9: folded BN shift.
    x_ref : (BN, H*W, TC) -- input block; channels on lanes, H*W on sublanes.
    o_ref : (BN, H*W, TC) -- output block (same dtype as the input).
    """
    HW = H * W
    w = w_ref[...]                                    # (10, TC) f32
    xf = x_ref[...].astype(jnp.float32)               # (BN, HW, TC)
    # TODO(synk): a bf16 MAC chain would halve VALU work for bf16 activations on
    # v6e/v7x; kept in f32 so the same kernel is also valid on v5e.

    pos = lax.broadcasted_iota(jnp.int32, xf.shape, 1)   # flattened index h*W + w
    col = pos % W

    # +-1 column neighbours: sublane roll (XLU) + edge-column zero mask.
    x_l = jnp.where(col == 0, 0.0,
                    pltpu.roll(xf, shift=1 % HW, axis=1))             # x[h, w-1]
    x_r = jnp.where(col == W - 1, 0.0,
                    pltpu.roll(xf, shift=(HW - 1) % HW, axis=1))      # x[h, w+1]

    # Horizontal combination for each vertical tap row (BN scale already folded).
    h_top = w[0] * x_l + w[1] * xf + w[2] * x_r       # contributes to the row below
    h_mid = w[3] * x_l + w[4] * xf + w[5] * x_r
    h_bot = w[6] * x_l + w[7] * xf + w[8] * x_r       # contributes to the row above

    # +-1 row shifts are +-W rolls of the flattened axis + first/last-row masks.
    top = jnp.where(pos < W, 0.0,
                    pltpu.roll(h_top, shift=W % HW, axis=1))
    bot = jnp.where(pos >= (H - 1) * W, 0.0,
                    pltpu.roll(h_bot, shift=(HW - W) % HW, axis=1))

    funnel = h_mid + top + bot + w[9]                 # + folded BatchNorm shift
    # FReLU: max(x, T(x)); max in f32, single cast (matches reference numerics).
    o_ref[...] = jnp.maximum(xf, funnel).astype(o_ref.dtype)


def _plan_blocks(N, C_pad, HW, itemsize):
    """Pick (block_n, block_c, vmem_limit_bytes) from the actual live-VMEM sum."""
    try:
        vmem_cap = pltpu.get_tpu_info().vmem_capacity_bytes   # 128 MiB v5e/v6e, 64 MiB v7x
    except Exception:
        vmem_cap = 64 * 1024 * 1024                           # conservative fallback
    vmem_limit = int(min(vmem_cap * 3 // 4, 100 * 1024 * 1024))  # leave compiler headroom

    # Live bytes per block element: double-buffered input + output blocks plus
    # headroom for the f32 elementwise intermediates of the fused tap chain.
    per_elem = 2 * itemsize + 2 * itemsize + 8 * 4
    max_block_elems = max(HW * 128, vmem_limit // per_elem)
    # TODO(synk): very large H*W would need spatial tiling with a 1-row halo;
    # not needed at FReLU-typical spatial sizes.

    block_c = 128
    for cand in range(128, C_pad + 1, 128):
        if C_pad % cand == 0 and HW * cand <= max_block_elems:
            block_c = cand
    block_n = 1
    for cand in range(1, N + 1):
        if N % cand == 0 and cand * HW * block_c <= max_block_elems:
            block_n = cand

    # Guarantee >= 2 grid steps so both TensorCores (v7x megacore) get work.
    if (N // block_n) * (C_pad // block_c) < 2:
        if block_n > 1:
            block_n = max(d for d in range(1, block_n) if N % d == 0)
        elif block_c > 128:
            block_c = max(d for d in range(128, block_c, 128) if C_pad % d == 0)
        # else: N == 1 and C_pad == 128 -> nothing left to split without spatial
        # tiling; accept a single-step grid.
    return block_n, block_c, vmem_limit


def frelu_nhwc(x_nhwc, dw_weight, bn_gamma, bn_beta, bn_mean, bn_var, eps=1e-5):
    """FReLU forward on an NHWC activation (fast path, no layout round trip)."""
    N, H, W, C = x_nhwc.shape
    itemsize = jnp.dtype(x_nhwc.dtype).itemsize

    # Fold BN (inference) into the 9 depthwise taps; keep the shift separate.
    scale = bn_gamma.astype(jnp.float32) / jnp.sqrt(bn_var.astype(jnp.float32) + eps)
    shift = bn_beta.astype(jnp.float32) - bn_mean.astype(jnp.float32) * scale
    w9 = dw_weight.reshape(C, 9).astype(jnp.float32) * scale[:, None]   # (C, 9)
    params = jnp.concatenate([w9.T, shift[None, :]], axis=0)            # (10, C)

    # Pad channels (lane dim) to a multiple of 128 -> dense, unmasked lane stores.
    C_pad = ((C + 127) // 128) * 128
    if C_pad != C:
        x_nhwc = jnp.pad(x_nhwc, ((0, 0), (0, 0), (0, 0), (0, C_pad - C)))
        params = jnp.pad(params, ((0, 0), (0, C_pad - C)))

    HW = H * W
    x_flat = x_nhwc.reshape(N, HW, C_pad)          # contiguous reshape: free

    block_n, block_c, vmem_limit = _plan_blocks(N, C_pad, HW, itemsize)
    grid = (C_pad // block_c, N // block_n)        # channel axis outer: params tile
                                                   # constant over the inner axis.

    kernel = functools.partial(_frelu_kernel, H=H, W=W)
    out_flat = pl.pallas_call(
        kernel,
        out_shape=jax.ShapeDtypeStruct((N, HW, C_pad), x_nhwc.dtype),
        grid_spec=pltpu.PrefetchScalarGridSpec(
            num_scalar_prefetch=0,
            grid=grid,
            in_specs=[
                pl.BlockSpec((10, block_c), lambda cb, nb: (0, cb)),
                pl.BlockSpec((block_n, HW, block_c), lambda cb, nb: (nb, 0, cb)),
            ],
            out_specs=pl.BlockSpec((block_n, HW, block_c),
                                   lambda cb, nb: (nb, 0, cb)),
        ),
        compiler_params=pltpu.CompilerParams(
            dimension_semantics=("parallel", "parallel"),
            vmem_limit_bytes=vmem_limit,
        ),
        cost_estimate=pl.CostEstimate(
            flops=19 * N * C_pad * HW,
            transcendentals=0,
            bytes_accessed=2 * N * HW * C_pad * itemsize + params.size * 4,
        ),
    )(params, x_flat)

    out = out_flat.reshape(N, H, W, C_pad)
    if C_pad != C:
        out = out[..., :C]
    return out


def frelu(x, dw_weight, bn_gamma, bn_beta, bn_mean, bn_var, eps=1e-5):
    """NCHW wrapper matching the PyTorch module's layout contract."""
    # TODO(synk): each NCHW<->NHWC transpose is a full HBM read+write; keep
    # activations NHWC across the surrounding model and call frelu_nhwc directly
    # to avoid ~3x extra HBM traffic for this memory-bound op.
    xt = jnp.transpose(x, (0, 2, 3, 1))
    out = frelu_nhwc(xt, dw_weight, bn_gamma, bn_beta, bn_mean, bn_var, eps=eps)
    return jnp.transpose(out, (0, 3, 1, 2))


def frelu_ref(x, dw_weight, bn_gamma, bn_beta, bn_mean, bn_var, eps=1e-5):
    C = x.shape[1]
    conv = lax.conv_general_dilated(
        x, dw_weight, window_strides=(1, 1), padding=((1, 1), (1, 1)),
        dimension_numbers=("NCHW", "OIHW", "NCHW"),
        feature_group_count=C)
    scale = bn_gamma / jnp.sqrt(bn_var + eps)
    shift = bn_beta - bn_mean * scale
    bn = conv * scale[None, :, None, None] + shift[None, :, None, None]
    return jnp.maximum(x, bn)


def _run_case(key, N, C, H, W):
    kx, kw, kg, kb, km, kv = jax.random.split(key, 6)
    x = jax.random.normal(kx, (N, C, H, W), dtype=jnp.float32)
    dw_weight = jax.random.normal(kw, (C, 1, 3, 3), dtype=jnp.float32) * 0.2
    bn_gamma = 1.0 + 0.1 * jax.random.normal(kg, (C,), dtype=jnp.float32)
    bn_beta = 0.1 * jax.random.normal(kb, (C,), dtype=jnp.float32)
    bn_mean = 0.1 * jax.random.normal(km, (C,), dtype=jnp.float32)
    bn_var = jax.random.uniform(kv, (C,), dtype=jnp.float32, minval=0.5, maxval=1.5)

    out = frelu(x, dw_weight, bn_gamma, bn_beta, bn_mean, bn_var)
    out = jax.block_until_ready(out)
    ref = frelu_ref(x, dw_weight, bn_gamma, bn_beta, bn_mean, bn_var)
    assert out.shape == (N, C, H, W)
    assert jnp.allclose(out, ref, atol=1e-4, rtol=1e-4), \
        f"mismatch vs reference for shape {(N, C, H, W)}"


if __name__ == "__main__":
    key = jax.random.PRNGKey(0)
    k1, k2 = jax.random.split(key)
    _run_case(k1, 2, 4, 16, 16)      # module-consistent small shape (pads C 4 -> 128)
    _run_case(k2, 2, 128, 16, 16)    # lane-dense path, no channel padding
    print("KERNEL_OK")
</pallas_src>

<mosaic_0001>
module attributes {stable_mosaic.version = 11 : i64} {
  func.func @_frelu_kernel(%arg0: i32, %arg1: i32, %arg2: memref<10x128xf32, #tpu.memory_space<vmem>>, %arg3: memref<1x256x128xf32, #tpu.memory_space<vmem>>, %arg4: memref<1x256x128xf32, #tpu.memory_space<vmem>>) attributes {dimension_semantics = [#tpu.dimension_semantics<parallel>, #tpu.dimension_semantics<parallel>], iteration_bounds = array<i64: 1, 2>, scalar_prefetch = 0 : i64, scratch_operands = 0 : i64, tpu.core_type = #tpu.core_type<tc>, window_params = [{transform_indices = @transform_0, window_bounds = array<i64: 10, 128>}, {transform_indices = @transform_1, window_bounds = array<i64: 1, 256, 128>}, {transform_indices = @transform_2, window_bounds = array<i64: 1, 256, 128>}]} {
    %c0 = arith.constant 0 : index
    %c0_0 = arith.constant 0 : index
    %0 = vector.load %arg2[%c0, %c0_0] : memref<10x128xf32, #tpu.memory_space<vmem>>, vector<10x128xf32>
    %c0_1 = arith.constant 0 : index
    %c0_2 = arith.constant 0 : index
    %c0_3 = arith.constant 0 : index
    %1 = vector.load %arg3[%c0_1, %c0_2, %c0_3] : memref<1x256x128xf32, #tpu.memory_space<vmem>>, vector<1x256x128xf32>
    %2 = tpu.iota {dimensions = array<i32: 1>} : vector<1x256x128xi32>
    %c16_i32 = arith.constant 16 : i32
    %c0_i32 = arith.constant 0 : i32
    %3 = arith.cmpi eq, %c16_i32, %c0_i32 : i32
    %c1_i32 = arith.constant 1 : i32
    %4 = arith.select %3, %c1_i32, %c16_i32 : i32
    %5 = vector.broadcast %4 : i32 to vector<1x256x128xi32>
    %6 = arith.remsi %2, %5 : vector<1x256x128xi32>
    %c0_i32_4 = arith.constant 0 : i32
    %7 = vector.broadcast %c0_i32_4 : i32 to vector<1x256x128xi32>
    %8 = arith.cmpi ne, %6, %7 : vector<1x256x128xi32>
    %c0_i32_5 = arith.constant 0 : i32
    %9 = vector.broadcast %c0_i32_5 : i32 to vector<1x256x128xi32>
    %10 = arith.cmpi slt, %6, %9 : vector<1x256x128xi32>
    %c0_i32_6 = arith.constant 0 : i32
    %11 = arith.cmpi slt, %4, %c0_i32_6 : i32
    %12 = vector.broadcast %11 : i1 to vector<1x256x128xi1>
    %13 = vector.broadcast %12 : vector<1x256x128xi1> to vector<1x256x128xi1>
    %14 = arith.xori %10, %13 : vector<1x256x128xi1>
    %15 = arith.andi %14, %8 : vector<1x256x128xi1>
    %16 = vector.broadcast %4 : i32 to vector<1x256x128xi32>
    %17 = arith.addi %6, %16 : vector<1x256x128xi32>
    %18 = arith.select %15, %17, %6 : vector<1x256x128xi1>, vector<1x256x128xi32>
    %c0_i32_7 = arith.constant 0 : i32
    %19 = vector.broadcast %c0_i32_7 : i32 to vector<1x256x128xi32>
    %20 = arith.cmpi eq, %18, %19 : vector<1x256x128xi32>
    %c1_i32_8 = arith.constant 1 : i32
    %21 = tpu.dynamic_rotate %1 by %c1_i32_8 dim 1 : vector<1x256x128xf32>, i32 -> vector<1x256x128xf32>
    %cst = arith.constant 0.000000e+00 : f32
    %22 = vector.broadcast %cst : f32 to vector<1x256x128xf32>
    %23 = arith.select %20, %22, %21 : vector<1x256x128xi1>, vector<1x256x128xf32>
    %c15_i32 = arith.constant 15 : i32
    %24 = vector.broadcast %c15_i32 : i32 to vector<1x256x128xi32>
    %25 = arith.cmpi eq, %18, %24 : vector<1x256x128xi32>
    %c255_i32 = arith.constant 255 : i32
    %26 = tpu.dynamic_rotate %1 by %c255_i32 dim 1 : vector<1x256x128xf32>, i32 -> vector<1x256x128xf32>
    %cst_9 = arith.constant 0.000000e+00 : f32
    %27 = vector.broadcast %cst_9 : f32 to vector<1x256x128xf32>
    %28 = arith.select %25, %27, %26 : vector<1x256x128xi1>, vector<1x256x128xf32>
    %29 = vector.extract_strided_slice %0 {offsets = [0, 0], sizes = [1, 128], strides = [1, 1]} : vector<10x128xf32> to vector<1x128xf32>
    %30 = vector.shape_cast %29 : vector<1x128xf32> to vector<128xf32>
    %31 = vector.shape_cast %30 : vector<128xf32> to vector<1x1x128xf32>
    %32 = vector.broadcast %31 : vector<1x1x128xf32> to vector<1x256x128xf32>
    %33 = arith.mulf %32, %23 : vector<1x256x128xf32>
    %34 = vector.extract_strided_slice %0 {offsets = [1, 0], sizes = [1, 128], strides = [1, 1]} : vector<10x128xf32> to vector<1x128xf32>
    %35 = vector.shape_cast %34 : vector<1x128xf32> to vector<128xf32>
    %36 = vector.shape_cast %35 : vector<128xf32> to vector<1x1x128xf32>
    %37 = vector.broadcast %36 : vector<1x1x128xf32> to vector<1x256x128xf32>
    %38 = arith.mulf %37, %1 : vector<1x256x128xf32>
    %39 = arith.addf %33, %38 : vector<1x256x128xf32>
    %40 = vector.extract_strided_slice %0 {offsets = [2, 0], sizes = [1, 128], strides = [1, 1]} : vector<10x128xf32> to vector<1x128xf32>
    %41 = vector.shape_cast %40 : vector<1x128xf32> to vector<128xf32>
    %42 = vector.shape_cast %41 : vector<128xf32> to vector<1x1x128xf32>
    %43 = vector.broadcast %42 : vector<1x1x128xf32> to vector<1x256x128xf32>
    %44 = arith.mulf %43, %28 : vector<1x256x128xf32>
    %45 = arith.addf %39, %44 : vector<1x256x128xf32>
    %46 = vector.extract_strided_slice %0 {offsets = [3, 0], sizes = [1, 128], strides = [1, 1]} : vector<10x128xf32> to vector<1x128xf32>
    %47 = vector.shape_cast %46 : vector<1x128xf32> to vector<128xf32>
    %48 = vector.shape_cast %47 : vector<128xf32> to vector<1x1x128xf32>
    %49 = vector.broadcast %48 : vector<1x1x128xf32> to vector<1x256x128xf32>
    %50 = arith.mulf %49, %23 : vector<1x256x128xf32>
    %51 = vector.extract_strided_slice %0 {offsets = [4, 0], sizes = [1, 128], strides = [1, 1]} : vector<10x128xf32> to vector<1x128xf32>
    %52 = vector.shape_cast %51 : vector<1x128xf32> to vector<128xf32>
    %53 = vector.shape_cast %52 : vector<128xf32> to vector<1x1x128xf32>
    %54 = vector.broadcast %53 : vector<1x1x128xf32> to vector<1x256x128xf32>
    %55 = arith.mulf %54, %1 : vector<1x256x128xf32>
    %56 = arith.addf %50, %55 : vector<1x256x128xf32>
    %57 = vector.extract_strided_slice %0 {offsets = [5, 0], sizes = [1, 128], strides = [1, 1]} : vector<10x128xf32> to vector<1x128xf32>
    %58 = vector.shape_cast %57 : vector<1x128xf32> to vector<128xf32>
    %59 = vector.shape_cast %58 : vector<128xf32> to vector<1x1x128xf32>
    %60 = vector.broadcast %59 : vector<1x1x128xf32> to vector<1x256x128xf32>
    %61 = arith.mulf %60, %28 : vector<1x256x128xf32>
    %62 = arith.addf %56, %61 : vector<1x256x128xf32>
    %63 = vector.extract_strided_slice %0 {offsets = [6, 0], sizes = [1, 128], strides = [1, 1]} : vector<10x128xf32> to vector<1x128xf32>
    %64 = vector.shape_cast %63 : vector<1x128xf32> to vector<128xf32>
    %65 = vector.shape_cast %64 : vector<128xf32> to vector<1x1x128xf32>
    %66 = vector.broadcast %65 : vector<1x1x128xf32> to vector<1x256x128xf32>
    %67 = arith.mulf %66, %23 : vector<1x256x128xf32>
    %68 = vector.extract_strided_slice %0 {offsets = [7, 0], sizes = [1, 128], strides = [1, 1]} : vector<10x128xf32> to vector<1x128xf32>
    %69 = vector.shape_cast %68 : vector<1x128xf32> to vector<128xf32>
    %70 = vector.shape_cast %69 : vector<128xf32> to vector<1x1x128xf32>
    %71 = vector.broadcast %70 : vector<1x1x128xf32> to vector<1x256x128xf32>
    %72 = arith.mulf %71, %1 : vector<1x256x128xf32>
    %73 = arith.addf %67, %72 : vector<1x256x128xf32>
    %74 = vector.extract_strided_slice %0 {offsets = [8, 0], sizes = [1, 128], strides = [1, 1]} : vector<10x128xf32> to vector<1x128xf32>
    %75 = vector.shape_cast %74 : vector<1x128xf32> to vector<128xf32>
    %76 = vector.shape_cast %75 : vector<128xf32> to vector<1x1x128xf32>
    %77 = vector.broadcast %76 : vector<1x1x128xf32> to vector<1x256x128xf32>
    %78 = arith.mulf %77, %28 : vector<1x256x128xf32>
    %79 = arith.addf %73, %78 : vector<1x256x128xf32>
    %c16_i32_10 = arith.constant 16 : i32
    %80 = vector.broadcast %c16_i32_10 : i32 to vector<1x256x128xi32>
    %81 = arith.cmpi slt, %2, %80 : vector<1x256x128xi32>
    %c16_i32_11 = arith.constant 16 : i32
    %82 = tpu.dynamic_rotate %45 by %c16_i32_11 dim 1 : vector<1x256x128xf32>, i32 -> vector<1x256x128xf32>
    %cst_12 = arith.constant 0.000000e+00 : f32
    %83 = vector.broadcast %cst_12 : f32 to vector<1x256x128xf32>
    %84 = arith.select %81, %83, %82 : vector<1x256x128xi1>, vector<1x256x128xf32>
    %c240_i32 = arith.constant 240 : i32
    %85 = vector.broadcast %c240_i32 : i32 to vector<1x256x128xi32>
    %86 = arith.cmpi sge, %2, %85 : vector<1x256x128xi32>
    %c240_i32_13 = arith.constant 240 : i32
    %87 = tpu.dynamic_rotate %79 by %c240_i32_13 dim 1 : vector<1x256x128xf32>, i32 -> vector<1x256x128xf32>
    %cst_14 = arith.constant 0.000000e+00 : f32
    %88 = vector.broadcast %cst_14 : f32 to vector<1x256x128xf32>
    %89 = arith.select %86, %88, %87 : vector<1x256x128xi1>, vector<1x256x128xf32>
    %90 = arith.addf %62, %84 : vector<1x256x128xf32>
    %91 = arith.addf %90, %89 : vector<1x256x128xf32>
    %92 = vector.extract_strided_slice %0 {offsets = [9, 0], sizes = [1, 128], strides = [1, 1]} : vector<10x128xf32> to vector<1x128xf32>
    %93 = vector.shape_cast %92 : vector<1x128xf32> to vector<128xf32>
    %94 = vector.shape_cast %93 : vector<128xf32> to vector<1x1x128xf32>
    %95 = vector.broadcast %94 : vector<1x1x128xf32> to vector<1x256x128xf32>
    %96 = arith.addf %91, %95 : vector<1x256x128xf32>
    %97 = arith.maximumf %1, %96 : vector<1x256x128xf32>
    %c0_15 = arith.constant 0 : index
    %c0_16 = arith.constant 0 : index
    %c0_17 = arith.constant 0 : index
    %98 = vector.load %arg4[%c0_15, %c0_16, %c0_17] : memref<1x256x128xf32, #tpu.memory_space<vmem>>, vector<1x256x128xf32>
    tpu.vector_store %arg4[%c0_15, %c0_16, %c0_17], %97 {strides = array<i32>} : memref<1x256x128xf32, #tpu.memory_space<vmem>>, vector<1x256x128xf32>,
    return
  }
  func.func @transform_0(%arg0: i32, %arg1: i32) -> (i32, i32) {
    %c0_i32 = arith.constant 0 : i32
    %c0_i32_0 = arith.constant 0 : i32
    return %c0_i32, %arg0 : i32, i32
  }
  func.func @transform_1(%arg0: i32, %arg1: i32) -> (i32, i32, i32) {
    %c0_i32 = arith.constant 0 : i32
    %c0_i32_0 = arith.constant 0 : i32
    return %arg1, %c0_i32, %arg0 : i32, i32, i32
  }
  func.func @transform_2(%arg0: i32, %arg1: i32) -> (i32, i32, i32) {
    %c0_i32 = arith.constant 0 : i32
    %c0_i32_0 = arith.constant 0 : i32
    return %arg1, %c0_i32, %arg0 : i32, i32, i32
  }
}

</mosaic_0001>

<bundles_post_ra>
// kernel: tpu_custom_call.1
= control target key start
LH: loop header
LB: loop body
LE: loop exit
PB: predicated region body
PF: predicated region fallthrough
CT: control target
= control target key end

     0   :  { %7 = vsyncpa [#allocation3], 0  ;;  %s3476_s0 = inlined_call_operand.hbm [shape: f32[10,128], index: 0, kind: input, shape index: {}]   ;;  %s3477_s1 = inlined_call_operand.hbm [shape: f32[2,256,128], index: 1, kind: input, shape index: {}]   ;;  %s3478_s2 = inlined_call_operand.hbm [shape: f32[2,256,128], index: 2, kind: output, shape index: {}]  }
   0x1   :  { %8 = vsyncpa [#allocation6], 0 }
   0x2   :  { %10 = vsyncpa [#allocation6 + $0x1], 0 }
   0x3   :  { %11 = vsyncpa [#allocation4], 0 }
   0x4   :  { %13 = vsyncpa [#allocation4 + $0x1], 0  ;;  %s2097_s9 = smov 0   ;;  %s2099_s10 = smov 0  }
   0x5   :  { %s2101_s11 = smov 0   ;;  %s2103_s12 = smov 0  }
   0x6   :  { %s2105_s13 = smov 0   ;;  %s2107_s14 = smov 0  }
   0x7 LB: > { %s1832_s15 = sadd.s32 4294967295, %s2073_s14   ;;  %s1833_s16 = sadd.s32 4294967294, %s2073_s14   ;;  %s2073_s14 = sphi %s2107_s14, %s19_s14   ;;  %s2069_s13 = sphi %s2105_s13, %s3506_s13   ;;  %s2065_s12 = sphi %s2103_s12, %s3505_s12   ;;  %s2061_s11 = sphi %s2101_s11, %s3504_s11   ;;  %s2057_s10 = sphi %s2099_s10, %s3503_s10   ;;  %s2053_s9 = sphi %s2097_s9, %s3502_s9  }
   0x8   : > { %p79_p0 = scmp.ne.s32.totalorder %s2057_s10, %s2053_s9  ;;  %p2131_p1 = scmp.eq.s32.totalorder %s1832_s15, 0 }
   0x9   : > { %p2135_p2 = scmp.eq.s32.totalorder %s1832_s15, 1  ;;  %p111_p3 = scmp.eq.s32.totalorder %s1833_s16, 1 }
   0xa   : > { %s3483_s17 = scalar_select %p2131_p1, 1, 0 }
   0xb   : > { %s3484_s18 = scalar_select %p2135_p2, 1, 0 }
   0xc   : > { %p2141_p4 = por %p2131_p1, %p79_p0  ;;  %p1834_p5 = scmp.ge.s32.totalorder %s2073_s14, 1 }
   0xd   : > { %p2146_p6 = por %p111_p3, %p79_p0  ;;  %p118_p7 = scmp.lt.s32.totalorder %s2073_s14, 3 }
   0xe   : > { %s3485_s19 = scalar_select %p2141_p4, 1, 0 }
   0xf   : > { %s3486_s20 = scalar_select %p2146_p6, 1, 0 }
  0x10   : > { %p2151_p8 = pnand %p1834_p5, %p118_p7  ;;  %s2075_s22 = smov [#allocation2]  }
  0x11   : > { %s132_s23 = sshll.u32 %s2075_s22, 4  ;;  %s28_s25 = sadd.s32 1, %s2069_s13  ;;  %s133_s23 = int_to_ptr.vmem [resolvable:$true] %s132_s23 }
  0x12   : > { %s3487_s21 = scalar_select %p2151_p8, 1, 0 }
  0x13   : > { %p1859_p9 = pneg %p2151_p8  ;;  %s1929_s28 = scalar_lea.hbm %s3476_s0, 256 }
  0x14   : > { %p1930_p12 = scmp.ne.s32.totalorder %s3476_s0, %s1929_s28  ;;  %p1936_p5 = scmp.lt.u32.totalorder %s1929_s28, %s3476_s0 }
  0x15   : > { %p2160_p11 = pnand %p1859_p9, %p2131_p1 }
  0x17   : > { %p1931_p13 = pneg %p2160_p11 }
  0x19   : > { %p1932_p0 = pnand %p1931_p13, %p1930_p12 }
  0x1b   : > { %p1933_p3 = pneg %p1932_p0 }
  0x1d   : > { %p1938_p7 = pnand %p1936_p5, %p1933_p3 }
  0x1f   : > { %1941 = shalt.err (!%p1938_p7)
}
  0x20   : > { %s1942_s5 = scalar_lea.vmem %s133_s23, 256  ;;  %p1950_p4 = scmp.lt.s32.totalorder %s133_s23, %s133_s23 }
  0x21   : > { %p1943_p9 = scmp.ne.s32.totalorder %s133_s23, %s1942_s5  ;;  %p1951_p1 = scmp.lt.s32.totalorder %s1942_s5, %s1942_s5 }
  0x23   : > { %p1945_p10 = pnand %p1943_p9, %p1931_p13  ;;  %p1952_p8 = por %p1951_p1, %p1950_p4 }
  0x25   : > { %p1946_p6 = pneg %p1945_p10 }
  0x27   : > { %p1953_p2 = pnand %p1952_p8, %p1946_p6 }
  0x29   : > { %1956 = shalt.err (!%p1953_p2)
}
  0x2a   : > { %s2076_s6 = smov 128   ;;  %s2077_s7 = smov 8  }
  0x2b   : > { %1862 = dma.hbm_to_vmem [thread:$0]  (!%p2160_p11), %s3476_s0, 256, %s133_s23, [#allocation3], %s2076_s6, %s2076_s6, %s2077_s7  }
  0x2c   : > { %p29_p1 = scmp.ge.s32.totalorder %s28_s25, 2  ;;  %s66_s16 = sadd.s32 1, %s2061_s11 }
  0x2d   : > { %p73_p2 = scmp.ne.s32.totalorder %s2061_s11, %s2057_s10  ;;  %p74_p4 = scmp.eq.s32.totalorder %s2073_s14, 0 }
  0x2e   : > { %s3508_s25 = smov (%p29_p1, %s28_s25), 0  ;;  %p3490_p8 = scmp.ne.s32.totalorder %s3484_s18, 0 }
  0x2f   : > { %p2190_p6 = por %p74_p4, %p73_p2  ;;  %s61_s26 = ssub.s32 %s2069_s13, %s3508_s25 }
  0x30   : > { %p2196_p10 = por %p3490_p8, %p73_p2  ;;  %p1872_p12 = scmp.lt.s32.totalorder %s2073_s14, 2 }
  0x31   : > { %p64_p11 = scmp.eq.s32.totalorder %s61_s26, 0  ;;  %s146_s23 = sand.u32 1, %s2061_s11  }
  0x32   : > { %s1837_s27 = sshll.u32 %s146_s23, 8  ;;  %s1849_s29 = sshll.u32 %s2069_s13, 12 }
  0x33   : > { %s2205_s28 = scalar_select %p64_p11, %s2061_s11, %s66_s16  }
  0x34   : > { %s2211_s4 = scalar_lea.hbm %s3477_s1, %s1849_s29  ;;  %s150_s18 = scalar_lea.vmem [#allocation5], %s1837_s27 }
  0x35   : > { %s158_s5 = sshll.u32 %s150_s18, 4  ;;  %p2217_p13 = pnand %p1872_p12, %p2190_p6  ;;  %s2213_s5 = int_to_ptr.vmem [resolvable:$true] %s158_s5 }
  0x36   : > { %s2221_s15 = scalar_lea.sflag [#allocation6], %s146_s23  ;;  %s1957_s16 = scalar_lea.hbm %s2211_s4, 4096 }
  0x37   : > { %p1958_p0 = scmp.ne.s32.totalorder %s2211_s4, %s1957_s16  ;;  %p1959_p3 = pneg %p2217_p13 }
  0x38   : > { %s1962_s22 = scalar_lea.hbm %s3477_s1, 8192  ;;  %p1963_p9 = scmp.lt.u32.totalorder %s2211_s4, %s3477_s1 }
  0x39   : > { %p1960_p5 = pnand %p1959_p3, %p1958_p0  ;;  %p1964_p1 = scmp.lt.u32.totalorder %s1962_s22, %s1957_s16 }
  0x3a   : > { %p1966_p4 = scmp.lt.u32.totalorder %s1957_s16, %s2211_s4 }
  0x3b   : > { %p1961_p7 = pneg %p1960_p5  ;;  %p1965_p2 = por %p1964_p1, %p1963_p9 }
  0x3d   : > { %p1967_p6 = por %p1966_p4, %p1965_p2 }
  0x3f   : > { %p1968_p8 = pnand %p1967_p6, %p1961_p7 }
  0x41   : > { %1971 = shalt.err (!%p1968_p8)
}
  0x42   : > { %s1972_s23 = scalar_lea.vmem %s2213_s5, 4096  ;;  %s2078_s3 = smov [#allocation5]  }
  0x43   : > { %p1973_p12 = scmp.ne.s32.totalorder %s2213_s5, %s1972_s23  ;;  %s1977_s18 = sshll.u32 %s2078_s3, 4  ;;  %s1978_s18 = int_to_ptr.vmem [resolvable:$false] %s1977_s18 }
  0x44   : > { %s1979_s26 = scalar_lea.vmem %s1978_s18, 8192  ;;  %p1980_p5 = scmp.lt.s32.totalorder %s2213_s5, %s1978_s18 }
  0x45   : > { %p1975_p11 = pnand %p1973_p12, %p1959_p3  ;;  %p1981_p9 = scmp.lt.s32.totalorder %s1979_s26, %s1972_s23 }
  0x47   : > { %p1976_p0 = pneg %p1975_p11  ;;  %p1982_p1 = por %p1981_p9, %p1980_p5 }
  0x49   : > { %p1983_p2 = pnand %p1982_p1, %p1976_p0 }
  0x4b   : > { %1986 = shalt.err (!%p1983_p2)
}
  0x4c   : > { %1866 = dma.hbm_to_vmem [thread:$0]  (!%p2217_p13), %s2211_s4, 4096, %s2213_s5, %s2221_s15, %s2076_s6, %s2076_s6, %s2077_s7  }
  0x4d   : > { %p3493_p3 = scmp.ne.s32.totalorder %s3487_s21, 0 }
  0x4e   : > { %p3494_p7 = scmp.ne.s32.totalorder (!%p3493_p3), %s3483_s17, 0 }
  0x4f   : > { %170 = sbr.rel (%p3493_p3) target bundleno = 330 (0x14a), region = 28 }
  0x56   : > { %2040 = dma.done.wait (%p3494_p7), [#allocation3], 256  }
  0x57   : > { %2042 = vsyncadd (%p3494_p7), [#allocation3], 4294967040  ;;  %s2259_s16 = sand.u32 1, %s2057_s10   ;;  %p3495_p13 = scmp.ne.s32.totalorder %s3485_s19, 0 }
  0x58   : > { %s1842_s8 = sshll.u32 %s2259_s16, 8  ;;  %s177_s27 = scalar_lea.sflag [#allocation6], %s2259_s16 }
  0x59   : > { %s2265_s6 = scalar_lea.vmem [#allocation5], %s1842_s8 }
  0x5a   : > { %2044 = dma.done.wait (%p3495_p13), %s177_s27, 4096  }
  0x5b   : > { %2046 = vsyncadd (%p3495_p13), %s177_s27, 4294963200  ;;  %v235_v0 = vlaneseq  ;;  %v2282_v10 = vld [vmem:[#allocation2] sm:$0xff]  ;;  %v2285_v11 = vld [vmem:[%s2265_s6] sm:$0xff]  ;;  %s2439_s17 = scalar_lea.vmem [#allocation7], %s1842_s8  ;;  %s1850_s19 = sshll.u32 %s2065_s12, 12 }
  0x5c   : > { %v2295_v16 = vld [vmem:[%s2265_s6 + $0x8] sm:$0xff]  ;;  %v2298_v17 = vld [vmem:[%s2265_s6 + $0x10] sm:$0xff]  ;;  %v684_v19 = vrot.slane %v2285_v11, 7  ;;  %v813_v20 = vrot.slane %v2285_v11, 1  ;;  %v2310_v22 = vld [vmem:[%s2265_s6 + $0x18] sm:$0xff]  ;;  %s1733_s21 = sshll.u32 %s2439_s17, 4  ;;  %s3423_s5 = scalar_lea.hbm %s3478_s2, %s1850_s19  ;;  %s3425_s21 = int_to_ptr.vmem [resolvable:$true] %s1733_s21 }
  0x5d   : > { %v2271_v1 = vshrl.u32 %v235_v0, 7  ;;  %v2313_v23 = vld [vmem:[%s2265_s6 + $0xf8] sm:$0xff]  ;;  %v685_v24 = vrot.slane %v2295_v16, 7  ;;  %v686_v25 = vrot.slane %v2298_v17, 7  ;;  %v814_v26 = vrot.slane %v2295_v16, 1  ;;  %v2374_v50 = vld [vmem:[%s2265_s6 + $0x20] sm:$0xff] }
  0x5e   : > { %v815_v27 = vrot.slane %v2298_v17, 1  ;;  %v715_v28 = vrot.slane %v2313_v23, 7  ;;  %v816_v29 = vrot.slane %v2310_v22, 1  ;;  %v202_v32 = vld [vmem:[#allocation2 + $0x8] sm:$0x3]  ;;  %v687_v52 = vrot.slane %v2310_v22, 7 }
  0x5f   : > { %v238_v2 = vadd.s32 16, %v2271_v1  ;;  %v272_v3 = vand.u32 15, %v2271_v1  ;;  %vm716_vm0 = vcmp.lt.s32.totalorder %v2271_v1, 1  ;;  %vm845_vm1 = vcmp.lt.s32.totalorder %v2271_v1, 7  ;;  %s1719_s12 = scalar_lea.sflag [#allocation4], %s2259_s16  ;;  %s1987_s15 = scalar_lea.vmem %s3425_s21, 4096 }
  0x60   : > { %v912_v4 = vsub.s32 0, %v2271_v1  ;;  %v1084_v5 = vsub.s32 3, %v2271_v1  ;;  %v948_v7 = vsub.s32 1, %v2271_v1  ;;  %v1120_v8 = vsub.s32 4, %v2271_v1  ;;  %p1988_p4 = scmp.ne.s32.totalorder %s3425_s21, %s1987_s15  ;;  %s2079_s22 = smov [#allocation7]  }
  0x61   : > { %v286_v6 = vand.u32 15, %v238_v2  ;;  %v1188_v9 = vsub.s32 5, %v2271_v1  ;;  %vm2287_vm2 = vcmp.eq.s32.totalorder %v272_v3, 0  ;;  %v1256_v13 = vsub.s32 6, %v2271_v1  ;;  %s1991_s29 = sshll.u32 %s2079_s22, 4  ;;  %s1992_s29 = int_to_ptr.vmem [resolvable:$false] %s1991_s29 }
  0x62   : > { %v1292_v14 = vsub.s32 7, %v2271_v1  ;;  %v237_v15 = vadd.s32 8, %v2271_v1  ;;  %v2307_v21 = vrot.slane %v2282_v10, %v1084_v5  ;;  %v2322_v30 = vrot.slane %v2282_v10, %v1120_v8  ;;  %p1989_p6 = pnand %p1988_p4, %p2196_p10  ;;  %s1993_s30 = scalar_lea.vmem %s1992_s29, 8192 }
  0x63   : > { %vm2300_vm3 = vcmp.eq.s32.totalorder %v286_v6, 0  ;;  %v2325_v31 = vrot.slane %v2282_v10, %v1188_v9  ;;  %v746_v33 = vsel %vm716_vm0, %v685_v24, %v686_v25  ;;  %v2333_v34 = vsel %vm845_vm1, %v813_v20, %v814_v26  ;;  %p1994_p12 = scmp.lt.s32.totalorder %s3425_s21, %s1992_s29  ;;  %p1995_p11 = scmp.lt.s32.totalorder %s1993_s30, %s1987_s15 }
  0x64   : > { %v2336_v35 = vrot.slane %v2282_v10, %v1256_v13  ;;  %v2339_v36 = vrot.slane %v2282_v10, %v1292_v14  ;;  %v748_v37 = vsel %vm716_vm0, %v715_v28, %v684_v19  ;;  %v2347_v38 = vsel %vm2300_vm3, 0.0, %v746_v33  ;;  %v2406_v13 = vld [vmem:[%s2265_s6 + $0x28] sm:$0xff]  ;;  %p1990_p8 = pneg %p1989_p6 }
  0x65   : > { %v2351_v39 = vsel %vm845_vm1, %v815_v27, %v816_v29  ;;  %v1122_v40 = vmul.f32 %v2322_v30, %v2285_v11  ;;  %v749_v41 = vsel %vm2287_vm2, 0.0, %v748_v37  ;;  %v1190_v42 = vmul.f32 %v2325_v31, %v2333_v34  ;;  %p1996_p0 = por %p1995_p11, %p1994_p12 }
  0x66   : > { %v1260_v43 = vmul.f32 %v2336_v35, %v2347_v38  ;;  %v1296_v44 = vmul.f32 %v2339_v36, %v2298_v17  ;;  %v1086_v45 = vmul.f32 %v2307_v21, %v749_v41  ;;  %v2366_v46 = vrot.slane %v202_v32, %v912_v4 }
  0x67   : > { %v2370_v47 = vrot.slane %v202_v32, %v948_v7  ;;  %v239_v48 = vadd.s32 24, %v2271_v1  ;;  %v279_v51 = vand.u32 15, %v237_v15  ;;  %v2379_v53 = vsel %vm716_vm0, %v684_v19, %v685_v24  ;;  %p1997_p5 = pnand %p1996_p0, %p1990_p8 }
  0x68   : > { %v1328_v49 = vadd.f32 %v1296_v44, %v1260_v43  ;;  %v1154_v54 = vadd.f32 %v1122_v40, %v1086_v45  ;;  %v1364_v55 = vmul.f32 %v2366_v46, %v2351_v39  ;;  %v817_v57 = vrot.slane %v2374_v50, 1 }
  0x69   : > { %v293_v56 = vand.u32 15, %v239_v48  ;;  %v2386_v58 = vsel %vm716_vm0, %v686_v25, %v687_v52  ;;  %vm782_vm4 = vcmp.eq.s32.totalorder %v279_v51, 15  ;;  %v875_v59 = vsel %vm845_vm1, %v814_v26, %v815_v27 }
  0x6a   : > { %v1087_v60 = vmul.f32 %v2307_v21, %v2379_v53  ;;  %v1222_v61 = vadd.f32 %v1190_v42, %v1154_v54  ;;  %v1396_v62 = vadd.f32 %v1364_v55, %v1328_v49  ;;  %v873_v63 = vsel %vm845_vm1, %v816_v29, %v817_v57 }
  0x6b   : > { %vm784_vm5 = vcmp.eq.s32.totalorder %v293_v56, 15  ;;  %v879_v0 = vsel %vm782_vm4, 0.0, %v875_v59  ;;  %v1123_v3 = vmul.f32 %v2322_v30, %v2295_v16  ;;  %v1261_v5 = vmul.f32 %v2336_v35, %v2386_v58 }
  0x6c   : > { %v2394_v2 = vsel %vm784_vm5, 0.0, %v873_v63  ;;  %v1586_v6 = vadd.f32 %v1396_v62, %v1222_v61  ;;  %v1191_v8 = vmul.f32 %v2325_v31, %v879_v0  ;;  %v1297_v9 = vmul.f32 %v2339_v36, %v2310_v22 }
  0x6d   : > { %v1365_v12 = vmul.f32 %v2366_v46, %v2394_v2  ;;  %v1155_v14 = vadd.f32 %v1123_v3, %v1087_v60  ;;  %v240_v15 = vadd.s32 32, %v2271_v1  ;;  %v688_v18 = vrot.slane %v2374_v50, 7  ;;  %v2457_v60 = vld [vmem:[%s2265_s6 + $0x30] sm:$0xff] }
  0x6e   : > { %v818_v19 = vrot.slane %v2406_v13, 1  ;;  %v1622_v24 = vadd.f32 %v2370_v47, %v1586_v6  ;;  %v1329_v25 = vadd.f32 %v1297_v9, %v1261_v5  ;;  %v2415_v26 = vrot.slane %v2282_v10, %v912_v4 }
  0x6f   : > { %v2420_v27 = vrot.slane %v2282_v10, %v948_v7  ;;  %v1223_v29 = vadd.f32 %v1191_v8, %v1155_v14  ;;  %v300_v32 = vand.u32 15, %v240_v15  ;;  %v744_v33 = vsel %vm716_vm0, %v687_v52, %v688_v18 }
  0x70   : > { %v2426_v37 = vsel %vm845_vm1, %v817_v57, %v818_v19  ;;  %v1654_v40 = vmax.f32 %v2285_v11, %v1622_v24  ;;  %v1397_v42 = vadd.f32 %v1365_v12, %v1329_v25  ;;  %v914_v4 = vmul.f32 %v2415_v26, %v749_v41 }
  0x71   : > { %v950_v43 = vmul.f32 %v2420_v27, %v2285_v11  ;;  %vm656_vm6 = vcmp.eq.s32.totalorder %v300_v32, 0  ;;  %v1016_v7 = vsub.s32 2, %v2271_v1  ;;  %v1088_v44 = vmul.f32 %v2307_v21, %v2347_v38 }
  0x72   : > { %v1124_v45 = vmul.f32 %v2322_v30, %v2298_v17  ;;  %1686 = vst [vmem:[%s2439_s17] sm:$0xff] %v1654_v40  ;;  %v1587_v48 = vadd.f32 %v1397_v42, %v1223_v29  ;;  %v2442_v41 = vsel %vm656_vm6, 0.0, %v744_v33  ;;  %v1192_v51 = vmul.f32 %v2325_v31, %v2351_v39 }
  0x73   : > { %v982_v49 = vadd.f32 %v950_v43, %v914_v4  ;;  %v2447_v52 = vrot.slane %v2282_v10, %v1016_v7  ;;  %v1262_v55 = vmul.f32 %v2336_v35, %v2442_v41  ;;  %v1298_v56 = vmul.f32 %v2339_v36, %v2374_v50  ;;  %v2492_v7 = vld [vmem:[%s2265_s6 + $0x38] sm:$0xff] }
  0x74   : > { %v1156_v54 = vadd.f32 %v1124_v45, %v1088_v44  ;;  %v1623_v57 = vadd.f32 %v2370_v47, %v1587_v48  ;;  %v1366_v59 = vmul.f32 %v2366_v46, %v2426_v37  ;;  %v241_v61 = vadd.s32 40, %v2271_v1 }
  0x75   : > { %v689_v10 = vrot.slane %v2406_v13, 7  ;;  %v1018_v62 = vmul.f32 %v2447_v52, %v2333_v34  ;;  %v1330_v3 = vadd.f32 %v1298_v56, %v1262_v55  ;;  %v819_v5 = vrot.slane %v2457_v60, 1 }
  0x76   : > { %v1224_v63 = vadd.f32 %v1192_v51, %v1156_v54  ;;  %v1655_v6 = vmax.f32 %v2295_v16, %v1623_v57  ;;  %v307_v8 = vand.u32 15, %v241_v61  ;;  %v915_v12 = vmul.f32 %v2415_v26, %v2379_v53 }
  0x77   : > { %v2467_v9 = vsel %vm716_vm0, %v688_v18, %v689_v10  ;;  %v1050_v14 = vadd.f32 %v1018_v62, %v982_v49  ;;  %v1398_v15 = vadd.f32 %v1366_v59, %v1330_v3  ;;  %v871_v24 = vsel %vm845_vm1, %v818_v19, %v819_v5 }
  0x78   : > { %v951_v34 = vmul.f32 %v2420_v27, %v2295_v16  ;;  %1687 = vst [vmem:[%s2439_s17 + $0x8] sm:$0xff] %v1655_v6  ;;  %vm786_vm7 = vcmp.eq.s32.totalorder %v307_v8, 15  ;;  %v1019_v25 = vmul.f32 %v2447_v52, %v879_v0  ;;  %v1089_v18 = vmul.f32 %v2307_v21, %v2386_v58 }
  0x79   : > { %v1125_v29 = vmul.f32 %v2322_v30, %v2310_v22  ;;  %v1556_v53 = vadd.f32 %v1224_v63, %v1050_v14  ;;  %v2481_v32 = vsel %vm786_vm7, 0.0, %v871_v24  ;;  %v1193_v19 = vmul.f32 %v2325_v31, %v2394_v2 }
  0x7a   : > { %v983_v33 = vadd.f32 %v951_v34, %v915_v12  ;;  %v1263_v16 = vmul.f32 %v2336_v35, %v2467_v9  ;;  %v1299_v0 = vmul.f32 %v2339_v36, %v2406_v13  ;;  %v1367_v42 = vmul.f32 %v2366_v46, %v2481_v32 }
  0x7b   : > { %v1157_v40 = vadd.f32 %v1125_v29, %v1089_v18  ;;  %v1588_v4 = vadd.f32 %v1556_v53, %v1398_v15  ;;  %v242_v44 = vadd.s32 48, %v2271_v1  ;;  %v690_v45 = vrot.slane %v2457_v60, 7  ;;  %v2528_v18 = vld [vmem:[%s2265_s6 + $0x40] sm:$0xff] }
  0x7c   : > { %v1051_v43 = vadd.f32 %v1019_v25, %v983_v33  ;;  %v1331_v49 = vadd.f32 %v1299_v0, %v1263_v16  ;;  %v820_v51 = vrot.slane %v2492_v7, 1  ;;  %v916_v54 = vmul.f32 %v2415_v26, %v2347_v38 }
  0x7d   : > { %v1225_v48 = vadd.f32 %v1193_v19, %v1157_v40  ;;  %v1624_v55 = vadd.f32 %v2370_v47, %v1588_v4  ;;  %v314_v56 = vand.u32 15, %v242_v44  ;;  %v742_v57 = vsel %vm716_vm0, %v689_v10, %v690_v45 }
  0x7e   : > { %v952_v59 = vmul.f32 %v2420_v27, %v2298_v17  ;;  %v1399_v61 = vadd.f32 %v1367_v42, %v1331_v49  ;;  %v2506_v63 = vsel %vm845_vm1, %v819_v5, %v820_v51  ;;  %v1020_v3 = vmul.f32 %v2447_v52, %v2351_v39 }
  0x7f   : > { %v1557_v62 = vadd.f32 %v1225_v48, %v1051_v43  ;;  %v1656_v38 = vmax.f32 %v2298_v17, %v1624_v55  ;;  %vm658_vm8 = vcmp.eq.s32.totalorder %v314_v56, 0  ;;  %v1090_v10 = vmul.f32 %v2307_v21, %v2442_v41 }
  0x80   : > { %v984_v6 = vadd.f32 %v952_v59, %v916_v54  ;;  %v2513_v12 = vsel %vm658_vm8, 0.0, %v742_v57  ;;  %v1126_v14 = vmul.f32 %v2322_v30, %v2374_v50  ;;  %v1194_v5 = vmul.f32 %v2325_v31, %v2426_v37 }
  0x81   : > { %v1589_v8 = vadd.f32 %v1557_v62, %v1399_v61  ;;  %1688 = vst [vmem:[%s2439_s17 + $0x10] sm:$0xff] %v1656_v38  ;;  %v1264_v39 = vmul.f32 %v2336_v35, %v2513_v12  ;;  %v1300_v17 = vmul.f32 %v2339_v36, %v2457_v60  ;;  %v1368_v24 = vmul.f32 %v2366_v46, %v2506_v63 }
  0x82   : > { %v1052_v15 = vadd.f32 %v1020_v3, %v984_v6  ;;  %v1158_v25 = vadd.f32 %v1126_v14, %v1090_v10  ;;  %v243_v29 = vadd.s32 56, %v2271_v1  ;;  %v691_v53 = vrot.slane %v2492_v7, 7  ;;  %v2562_v3 = vld [vmem:[%s2265_s6 + $0x48] sm:$0xff] }
  0x83   : > { %v1625_v34 = vadd.f32 %v2370_v47, %v1589_v8  ;;  %v1332_v33 = vadd.f32 %v1300_v17, %v1264_v39  ;;  %v821_v19 = vrot.slane %v2528_v18, 1  ;;  %v917_v40 = vmul.f32 %v2415_v26, %v2386_v58 }
  0x84   : > { %v953_v16 = vmul.f32 %v2420_v27, %v2310_v22  ;;  %v1226_v42 = vadd.f32 %v1194_v5, %v1158_v25  ;;  %v321_v4 = vand.u32 15, %v243_v29  ;;  %v2540_v43 = vsel %vm716_vm0, %v690_v45, %v691_v53 }
  0x85   : > { %v1657_v0 = vmax.f32 %v2310_v22, %v1625_v34  ;;  %v1400_v44 = vadd.f32 %v1368_v24, %v1332_v33  ;;  %v869_v48 = vsel %vm845_vm1, %v820_v51, %v821_v19  ;;  %v1021_v58 = vmul.f32 %v2447_v52, %v2394_v2 }
  0x86   : > { %v985_v49 = vadd.f32 %v953_v16, %v917_v40  ;;  %v1558_v54 = vadd.f32 %v1226_v42, %v1052_v15  ;;  %vm788_vm9 = vcmp.eq.s32.totalorder %v321_v4, 15  ;;  %v1091_v22 = vmul.f32 %v2307_v21, %v2467_v9 }
  0x87   : > { %1689 = vst [vmem:[%s2439_s17 + $0x18] sm:$0xff] %v1657_v0  ;;  %v1127_v55 = vmul.f32 %v2322_v30, %v2406_v13  ;;  %v2551_v45 = vsel %vm788_vm9, 0.0, %v869_v48  ;;  %v1195_v51 = vmul.f32 %v2325_v31, %v2481_v32  ;;  %v1265_v57 = vmul.f32 %v2336_v35, %v2540_v43 }
  0x88   : > { %v1053_v56 = vadd.f32 %v1021_v58, %v985_v49  ;;  %v1590_v59 = vadd.f32 %v1558_v54, %v1400_v44  ;;  %v1301_v61 = vmul.f32 %v2339_v36, %v2492_v7  ;;  %v1369_v62 = vmul.f32 %v2366_v46, %v2551_v45  ;;  %v2597_v49 = vld [vmem:[%s2265_s6 + $0x50] sm:$0xff] }
  0x89   : > { %v1159_v2 = vadd.f32 %v1127_v55, %v1091_v22  ;;  %v244_v38 = vadd.s32 64, %v2271_v1  ;;  %v692_v6 = vrot.slane %v2528_v18, 7  ;;  %v822_v10 = vrot.slane %v2562_v3, 1 }
  0x8a   : > { %v918_v8 = vmul.f32 %v2415_v26, %v2442_v41  ;;  %v1626_v14 = vadd.f32 %v2370_v47, %v1590_v59  ;;  %v1333_v15 = vadd.f32 %v1301_v61, %v1265_v57  ;;  %v954_v39 = vmul.f32 %v2420_v27, %v2374_v50 }
  0x8b   : > { %v1227_v5 = vadd.f32 %v1195_v51, %v1159_v2  ;;  %v328_v17 = vand.u32 15, %v244_v38  ;;  %v740_v24 = vsel %vm716_vm0, %v691_v53, %v692_v6  ;;  %v2576_v34 = vsel %vm845_vm1, %v821_v19, %v822_v10 }
  0x8c   : > { %v1022_v25 = vmul.f32 %v2447_v52, %v2426_v37  ;;  %v1658_v41 = vmax.f32 %v2374_v50, %v1626_v14  ;;  %v1401_v29 = vadd.f32 %v1369_v62, %v1333_v15  ;;  %v986_v40 = vadd.f32 %v954_v39, %v918_v8 }
  0x8d   : > { %v1559_v33 = vadd.f32 %v1227_v5, %v1053_v56  ;;  %vm660_vm10 = vcmp.eq.s32.totalorder %v328_v17, 0  ;;  %v1092_v16 = vmul.f32 %v2307_v21, %v2513_v12  ;;  %v1128_v53 = vmul.f32 %v2322_v30, %v2457_v60 }
  0x8e   : > { %v1196_v19 = vmul.f32 %v2325_v31, %v2506_v63  ;;  %1690 = vst [vmem:[%s2439_s17 + $0x20] sm:$0xff] %v1658_v41  ;;  %v2588_v42 = vsel %vm660_vm10, 0.0, %v740_v24  ;;  %v1054_v37 = vadd.f32 %v1022_v25, %v986_v40  ;;  %v1302_v50 = vmul.f32 %v2339_v36, %v2528_v18 }
  0x8f   : > { %v1591_v0 = vadd.f32 %v1559_v33, %v1401_v29  ;;  %v1160_v4 = vadd.f32 %v1128_v53, %v1092_v16  ;;  %v1266_v44 = vmul.f32 %v2336_v35, %v2588_v42  ;;  %v1370_v48 = vmul.f32 %v2366_v46, %v2576_v34  ;;  %v2632_v29 = vld [vmem:[%s2265_s6 + $0x58] sm:$0xff] }
  0x90   : > { %v245_v58 = vadd.s32 72, %v2271_v1  ;;  %v693_v22 = vrot.slane %v2562_v3, 7  ;;  %v823_v55 = vrot.slane %v2597_v49, 1  ;;  %v919_v56 = vmul.f32 %v2415_v26, %v2467_v9 }
  0x91   : > { %v1627_v54 = vadd.f32 %v2370_v47, %v1591_v0  ;;  %v1228_v51 = vadd.f32 %v1196_v19, %v1160_v4  ;;  %v1334_v57 = vadd.f32 %v1302_v50, %v1266_v44  ;;  %v955_v2 = vmul.f32 %v2420_v27, %v2406_v13 }
  0x92   : > { %v335_v59 = vand.u32 15, %v245_v58  ;;  %v2610_v62 = vsel %vm716_vm0, %v692_v6, %v693_v22  ;;  %v867_v38 = vsel %vm845_vm1, %v822_v10, %v823_v55  ;;  %v1023_v8 = vmul.f32 %v2447_v52, %v2481_v32 }
  0x93   : > { %v1659_v61 = vmax.f32 %v2406_v13, %v1627_v54  ;;  %v1402_v9 = vadd.f32 %v1370_v48, %v1334_v57  ;;  %v1560_v14 = vadd.f32 %v1228_v51, %v1054_v37  ;;  %v987_v5 = vadd.f32 %v955_v2, %v919_v56 }
  0x94   : > { %vm790_vm11 = vcmp.eq.s32.totalorder %v335_v59, 15  ;;  %v1093_v13 = vmul.f32 %v2307_v21, %v2540_v43  ;;  %v1129_v6 = vmul.f32 %v2322_v30, %v2492_v7  ;;  %v1197_v10 = vmul.f32 %v2325_v31, %v2551_v45 }
  0x95   : > { %1691 = vst [vmem:[%s2439_s17 + $0x28] sm:$0xff] %v1659_v61  ;;  %v2617_v15 = vsel %vm790_vm11, 0.0, %v867_v38  ;;  %v1592_v39 = vadd.f32 %v1560_v14, %v1402_v9  ;;  %v1055_v17 = vadd.f32 %v1023_v8, %v987_v5  ;;  %v1267_v32 = vmul.f32 %v2336_v35, %v2610_v62  ;;  %v2667_v8 = vld [vmem:[%s2265_s6 + $0x60] sm:$0xff] }
  0x96   : > { %v1303_v24 = vmul.f32 %v2339_v36, %v2562_v3  ;;  %v1161_v25 = vadd.f32 %v1129_v6, %v1093_v13  ;;  %v1371_v41 = vmul.f32 %v2366_v46, %v2617_v15  ;;  %v246_v33 = vadd.s32 80, %v2271_v1 }
  0x97   : > { %v694_v40 = vrot.slane %v2597_v49, 7  ;;  %v1628_v16 = vadd.f32 %v2370_v47, %v1592_v39  ;;  %v824_v19 = vrot.slane %v2632_v29, 1  ;;  %v920_v0 = vmul.f32 %v2415_v26, %v2513_v12 }
  0x98   : > { %v1335_v53 = vadd.f32 %v1303_v24, %v1267_v32  ;;  %v1229_v37 = vadd.f32 %v1197_v10, %v1161_v25  ;;  %v342_v50 = vand.u32 15, %v246_v33  ;;  %v956_v44 = vmul.f32 %v2420_v27, %v2457_v60 }
  0x99   : > { %v738_v4 = vsel %vm716_vm0, %v693_v22, %v694_v40  ;;  %v1660_v48 = vmax.f32 %v2457_v60, %v1628_v16  ;;  %v2647_v54 = vsel %vm845_vm1, %v823_v55, %v824_v19  ;;  %v1024_v56 = vmul.f32 %v2447_v52, %v2506_v63 }
  0x9a   : > { %v1403_v58 = vadd.f32 %v1371_v41, %v1335_v53  ;;  %v1561_v12 = vadd.f32 %v1229_v37, %v1055_v17  ;;  %vm662_vm12 = vcmp.eq.s32.totalorder %v342_v50, 0  ;;  %v988_v51 = vadd.f32 %v956_v44, %v920_v0 }
  0x9b   : > { %v1094_v22 = vmul.f32 %v2307_v21, %v2588_v42  ;;  %1692 = vst [vmem:[%s2439_s17 + $0x30] sm:$0xff] %v1660_v48  ;;  %v2654_v57 = vsel %vm662_vm12, 0.0, %v738_v4  ;;  %v1130_v60 = vmul.f32 %v2322_v30, %v2528_v18  ;;  %v1198_v59 = vmul.f32 %v2325_v31, %v2576_v34 }
  0x9c   : > { %v1304_v55 = vmul.f32 %v2339_v36, %v2597_v49  ;;  %v1593_v2 = vadd.f32 %v1561_v12, %v1403_v58  ;;  %v1056_v63 = vadd.f32 %v1024_v56, %v988_v51  ;;  %v1268_v61 = vmul.f32 %v2336_v35, %v2654_v57  ;;  %v2702_v56 = vld [vmem:[%s2265_s6 + $0x68] sm:$0xff] }
  0x9d   : > { %v1372_v38 = vmul.f32 %v2366_v46, %v2647_v54  ;;  %v1162_v9 = vadd.f32 %v1130_v60, %v1094_v22  ;;  %v247_v14 = vadd.s32 88, %v2271_v1  ;;  %v695_v5 = vrot.slane %v2632_v29, 7 }
  0x9e   : > { %v825_v13 = vrot.slane %v2667_v8, 1  ;;  %v1629_v6 = vadd.f32 %v2370_v47, %v1593_v2  ;;  %v1336_v10 = vadd.f32 %v1304_v55, %v1268_v61  ;;  %v921_v39 = vmul.f32 %v2415_v26, %v2540_v43 }
  0x9f   : > { %v957_v17 = vmul.f32 %v2420_v27, %v2492_v7  ;;  %v1230_v32 = vadd.f32 %v1198_v59, %v1162_v9  ;;  %v349_v24 = vand.u32 15, %v247_v14  ;;  %v2679_v25 = vsel %vm716_vm0, %v694_v40, %v695_v5 }
  0xa0   : > { %v865_v41 = vsel %vm845_vm1, %v824_v19, %v825_v13  ;;  %v1661_v33 = vmax.f32 %v2492_v7, %v1629_v6  ;;  %v1404_v16 = vadd.f32 %v1372_v38, %v1336_v10  ;;  %v1025_v43 = vmul.f32 %v2447_v52, %v2551_v45 }
  0xa1   : > { %v989_v53 = vadd.f32 %v957_v17, %v921_v39  ;;  %v1562_v0 = vadd.f32 %v1230_v32, %v1056_v63  ;;  %vm792_vm13 = vcmp.eq.s32.totalorder %v349_v24, 15  ;;  %v1095_v37 = vmul.f32 %v2307_v21, %v2610_v62 }
  0xa2   : > { %v1131_v40 = vmul.f32 %v2322_v30, %v2562_v3  ;;  %1693 = vst [vmem:[%s2439_s17 + $0x38] sm:$0xff] %v1661_v33  ;;  %v2691_v50 = vsel %vm792_vm13, 0.0, %v865_v41  ;;  %v1199_v7 = vmul.f32 %v2325_v31, %v2617_v15  ;;  %v1269_v4 = vmul.f32 %v2336_v35, %v2679_v25 }
  0xa3   : > { %v1057_v19 = vadd.f32 %v1025_v43, %v989_v53  ;;  %v1594_v44 = vadd.f32 %v1562_v0, %v1404_v16  ;;  %v1305_v48 = vmul.f32 %v2339_v36, %v2632_v29  ;;  %v1373_v58 = vmul.f32 %v2366_v46, %v2691_v50  ;;  %v2737_v53 = vld [vmem:[%s2265_s6 + $0x70] sm:$0xff] }
  0xa4   : > { %v1163_v45 = vadd.f32 %v1131_v40, %v1095_v37  ;;  %v248_v12 = vadd.s32 96, %v2271_v1  ;;  %v696_v51 = vrot.slane %v2667_v8, 7  ;;  %v826_v22 = vrot.slane %v2702_v56, 1 }
  0xa5   : > { %v922_v60 = vmul.f32 %v2415_v26, %v2588_v42  ;;  %v1630_v59 = vadd.f32 %v2370_v47, %v1594_v44  ;;  %v1337_v2 = vadd.f32 %v1305_v48, %v1269_v4  ;;  %v958_v63 = vmul.f32 %v2420_v27, %v2528_v18 }
  0xa6   : > { %v1231_v55 = vadd.f32 %v1199_v7, %v1163_v45  ;;  %v356_v61 = vand.u32 15, %v248_v12  ;;  %v736_v38 = vsel %vm716_vm0, %v695_v5, %v696_v51  ;;  %v2716_v9 = vsel %vm845_vm1, %v825_v13, %v826_v22 }
  0xa7   : > { %v1026_v14 = vmul.f32 %v2447_v52, %v2576_v34  ;;  %v1662_v42 = vmax.f32 %v2528_v18, %v1630_v59  ;;  %v1405_v6 = vadd.f32 %v1373_v58, %v1337_v2  ;;  %v990_v39 = vadd.f32 %v958_v63, %v922_v60 }
  0xa8   : > { %v1563_v10 = vadd.f32 %v1231_v55, %v1057_v19  ;;  %vm664_vm14 = vcmp.eq.s32.totalorder %v356_v61, 0  ;;  %v1096_v17 = vmul.f32 %v2307_v21, %v2654_v57  ;;  %v1132_v5 = vmul.f32 %v2322_v30, %v2597_v49 }
  0xa9   : > { %v1200_v13 = vmul.f32 %v2325_v31, %v2647_v54  ;;  %1694 = vst [vmem:[%s2439_s17 + $0x40] sm:$0xff] %v1662_v42  ;;  %v2728_v24 = vsel %vm664_vm14, 0.0, %v736_v38  ;;  %v1058_v34 = vadd.f32 %v1026_v14, %v990_v39  ;;  %v1306_v18 = vmul.f32 %v2339_v36, %v2667_v8 }
  0xaa   : > { %v1595_v32 = vadd.f32 %v1563_v10, %v1405_v6  ;;  %v1164_v41 = vadd.f32 %v1132_v5, %v1096_v17  ;;  %v1270_v33 = vmul.f32 %v2336_v35, %v2728_v24  ;;  %v1374_v16 = vmul.f32 %v2366_v46, %v2716_v9  ;;  %v2772_v6 = vld [vmem:[%s2265_s6 + $0x78] sm:$0xff] }
  0xab   : > { %v249_v43 = vadd.s32 104, %v2271_v1  ;;  %v697_v37 = vrot.slane %v2702_v56, 7  ;;  %v827_v40 = vrot.slane %v2737_v53, 1  ;;  %v923_v19 = vmul.f32 %v2415_v26, %v2610_v62 }
  0xac   : > { %v1631_v0 = vadd.f32 %v2370_v47, %v1595_v32  ;;  %v1232_v7 = vadd.f32 %v1200_v13, %v1164_v41  ;;  %v1338_v4 = vadd.f32 %v1306_v18, %v1270_v33  ;;  %v959_v45 = vmul.f32 %v2420_v27, %v2562_v3 }
  0xad   : > { %v363_v44 = vand.u32 15, %v249_v43  ;;  %v2750_v58 = vsel %vm716_vm0, %v696_v51, %v697_v37  ;;  %v863_v12 = vsel %vm845_vm1, %v826_v22, %v827_v40  ;;  %v1027_v60 = vmul.f32 %v2447_v52, %v2617_v15 }
  0xae   : > { %v1663_v48 = vmax.f32 %v2562_v3, %v1631_v0  ;;  %v1406_v62 = vadd.f32 %v1374_v16, %v1338_v4  ;;  %v1564_v59 = vadd.f32 %v1232_v7, %v1058_v34  ;;  %v991_v55 = vadd.f32 %v959_v45, %v923_v19 }
  0xaf   : > { %vm794_vm15 = vcmp.eq.s32.totalorder %v363_v44, 15  ;;  %v1097_v3 = vmul.f32 %v2307_v21, %v2679_v25  ;;  %v1133_v51 = vmul.f32 %v2322_v30, %v2632_v29  ;;  %v1201_v22 = vmul.f32 %v2325_v31, %v2691_v50 }
  0xb0   : > { %1695 = vst [vmem:[%s2439_s17 + $0x48] sm:$0xff] %v1663_v48  ;;  %v2757_v2 = vsel %vm794_vm15, 0.0, %v863_v12  ;;  %v1596_v63 = vadd.f32 %v1564_v59, %v1406_v62  ;;  %v1059_v61 = vadd.f32 %v1027_v60, %v991_v55  ;;  %v1271_v15 = vmul.f32 %v2336_v35, %v2750_v58  ;;  %v2807_v60 = vld [vmem:[%s2265_s6 + $0x80] sm:$0xff] }
  0xb1   : > { %v1307_v38 = vmul.f32 %v2339_v36, %v2702_v56  ;;  %v1165_v14 = vadd.f32 %v1133_v51, %v1097_v3  ;;  %v1375_v42 = vmul.f32 %v2366_v46, %v2757_v2  ;;  %v250_v10 = vadd.s32 112, %v2271_v1 }
  0xb2   : > { %v698_v39 = vrot.slane %v2737_v53, 7  ;;  %v1632_v17 = vadd.f32 %v2370_v47, %v1596_v63  ;;  %v828_v13 = vrot.slane %v2772_v6, 1  ;;  %v924_v32 = vmul.f32 %v2415_v26, %v2654_v57 }
  0xb3   : > { %v1339_v5 = vadd.f32 %v1307_v38, %v1271_v15  ;;  %v1233_v34 = vadd.f32 %v1201_v22, %v1165_v14  ;;  %v370_v18 = vand.u32 15, %v250_v10  ;;  %v960_v33 = vmul.f32 %v2420_v27, %v2597_v49 }
  0xb4   : > { %v734_v41 = vsel %vm716_vm0, %v697_v37, %v698_v39  ;;  %v1664_v16 = vmax.f32 %v2597_v49, %v1632_v17  ;;  %v2787_v0 = vsel %vm845_vm1, %v827_v40, %v828_v13  ;;  %v1028_v19 = vmul.f32 %v2447_v52, %v2647_v54 }
  0xb5   : > { %v1407_v43 = vadd.f32 %v1375_v42, %v1339_v5  ;;  %v1565_v57 = vadd.f32 %v1233_v34, %v1059_v61  ;;  %vm666_vm2 = vcmp.eq.s32.totalorder %v370_v18, 0  ;;  %v992_v7 = vadd.f32 %v960_v33, %v924_v32 }
  0xb6   : > { %v1098_v37 = vmul.f32 %v2307_v21, %v2728_v24  ;;  %1696 = vst [vmem:[%s2439_s17 + $0x50] sm:$0xff] %v1664_v16  ;;  %v2794_v4 = vsel %vm666_vm2, 0.0, %v734_v41  ;;  %v1134_v49 = vmul.f32 %v2322_v30, %v2667_v8  ;;  %v1202_v44 = vmul.f32 %v2325_v31, %v2716_v9 }
  0xb7   : > { %v1308_v40 = vmul.f32 %v2339_v36, %v2737_v53  ;;  %v1597_v45 = vadd.f32 %v1565_v57, %v1407_v43  ;;  %v1060_v54 = vadd.f32 %v1028_v19, %v992_v7  ;;  %v1272_v48 = vmul.f32 %v2336_v35, %v2794_v4  ;;  %v2842_v19 = vld [vmem:[%s2265_s6 + $0x88] sm:$0xff] }
  0xb8   : > { %v1376_v12 = vmul.f32 %v2366_v46, %v2787_v0  ;;  %v1166_v62 = vadd.f32 %v1134_v49, %v1098_v37  ;;  %v251_v59 = vadd.s32 120, %v2271_v1  ;;  %v699_v55 = vrot.slane %v2772_v6, 7 }
  0xb9   : > { %v829_v3 = vrot.slane %v2807_v60, 1  ;;  %v1633_v51 = vadd.f32 %v2370_v47, %v1597_v45  ;;  %v1340_v22 = vadd.f32 %v1308_v40, %v1272_v48  ;;  %v925_v63 = vmul.f32 %v2415_v26, %v2679_v25 }
  0xba   : > { %v961_v61 = vmul.f32 %v2420_v27, %v2632_v29  ;;  %v1234_v15 = vadd.f32 %v1202_v44, %v1166_v62  ;;  %v377_v38 = vand.u32 15, %v251_v59  ;;  %v2819_v14 = vsel %vm716_vm0, %v698_v39, %v699_v55 }
  0xbb   : > { %v861_v42 = vsel %vm845_vm1, %v828_v13, %v829_v3  ;;  %v1665_v10 = vmax.f32 %v2632_v29, %v1633_v51  ;;  %v1408_v17 = vadd.f32 %v1376_v12, %v1340_v22  ;;  %v1029_v25 = vmul.f32 %v2447_v52, %v2691_v50 }
  0xbc   : > { %v993_v5 = vadd.f32 %v961_v61, %v925_v63  ;;  %v1566_v32 = vadd.f32 %v1234_v15, %v1060_v54  ;;  %vm796_vm3 = vcmp.eq.s32.totalorder %v377_v38, 15  ;;  %v1099_v34 = vmul.f32 %v2307_v21, %v2750_v58 }
  0xbd   : > { %v1135_v39 = vmul.f32 %v2322_v30, %v2702_v56  ;;  %1697 = vst [vmem:[%s2439_s17 + $0x58] sm:$0xff] %v1665_v10  ;;  %v2831_v18 = vsel %vm796_vm3, 0.0, %v861_v42  ;;  %v1203_v29 = vmul.f32 %v2325_v31, %v2757_v2  ;;  %v1273_v41 = vmul.f32 %v2336_v35, %v2819_v14 }
  0xbe   : > { %v1061_v13 = vadd.f32 %v1029_v25, %v993_v5  ;;  %v1598_v33 = vadd.f32 %v1566_v32, %v1408_v17  ;;  %v1309_v16 = vmul.f32 %v2339_v36, %v2772_v6  ;;  %v1377_v43 = vmul.f32 %v2366_v46, %v2831_v18  ;;  %v2877_v5 = vld [vmem:[%s2265_s6 + $0x90] sm:$0xff] }
  0xbf   : > { %v1167_v50 = vadd.f32 %v1135_v39, %v1099_v34  ;;  %v252_v57 = vadd.s32 128, %v2271_v1  ;;  %v700_v7 = vrot.slane %v2807_v60, 7  ;;  %v830_v37 = vrot.slane %v2842_v19, 1 }
  0xc0   : > { %v926_v49 = vmul.f32 %v2415_v26, %v2728_v24  ;;  %v1634_v44 = vadd.f32 %v2370_v47, %v1598_v33  ;;  %v1341_v45 = vadd.f32 %v1309_v16, %v1273_v41  ;;  %v962_v54 = vmul.f32 %v2420_v27, %v2667_v8 }
  0xc1   : > { %v1235_v40 = vadd.f32 %v1203_v29, %v1167_v50  ;;  %v384_v48 = vand.u32 15, %v252_v57  ;;  %v732_v12 = vsel %vm716_vm0, %v699_v55, %v700_v7  ;;  %v2856_v62 = vsel %vm845_vm1, %v829_v3, %v830_v37 }
  0xc2   : > { %v1030_v59 = vmul.f32 %v2447_v52, %v2716_v9  ;;  %v1666_v24 = vmax.f32 %v2667_v8, %v1634_v44  ;;  %v1409_v51 = vadd.f32 %v1377_v43, %v1341_v45  ;;  %v994_v63 = vadd.f32 %v962_v54, %v926_v49 }
  0xc3   : > { %v1567_v22 = vadd.f32 %v1235_v40, %v1061_v13  ;;  %vm668_vm4 = vcmp.eq.s32.totalorder %v384_v48, 0  ;;  %v1100_v61 = vmul.f32 %v2307_v21, %v2794_v4  ;;  %v1136_v55 = vmul.f32 %v2322_v30, %v2737_v53 }
  0xc4   : > { %v1204_v3 = vmul.f32 %v2325_v31, %v2787_v0  ;;  %1698 = vst [vmem:[%s2439_s17 + $0x60] sm:$0xff] %v1666_v24  ;;  %v2868_v38 = vsel %vm668_vm4, 0.0, %v732_v12  ;;  %v1062_v9 = vadd.f32 %v1030_v59, %v994_v63  ;;  %v1310_v8 = vmul.f32 %v2339_v36, %v2807_v60 }
  0xc5   : > { %v1599_v15 = vadd.f32 %v1567_v22, %v1409_v51  ;;  %v1168_v42 = vadd.f32 %v1136_v55, %v1100_v61  ;;  %v1274_v10 = vmul.f32 %v2336_v35, %v2868_v38  ;;  %v1378_v17 = vmul.f32 %v2366_v46, %v2856_v62  ;;  %v2912_v51 = vld [vmem:[%s2265_s6 + $0x98] sm:$0xff] }
  0xc6   : > { %v253_v25 = vadd.s32 136, %v2271_v1  ;;  %v701_v34 = vrot.slane %v2842_v19, 7  ;;  %v831_v39 = vrot.slane %v2877_v5, 1  ;;  %v927_v13 = vmul.f32 %v2415_v26, %v2750_v58 }
  0xc7   : > { %v1635_v32 = vadd.f32 %v2370_v47, %v1599_v15  ;;  %v1236_v29 = vadd.f32 %v1204_v3, %v1168_v42  ;;  %v1342_v41 = vadd.f32 %v1310_v8, %v1274_v10  ;;  %v963_v50 = vmul.f32 %v2420_v27, %v2702_v56 }
  0xc8   : > { %v391_v33 = vand.u32 15, %v253_v25  ;;  %v2890_v43 = vsel %vm716_vm0, %v700_v7, %v701_v34  ;;  %v859_v57 = vsel %vm845_vm1, %v830_v37, %v831_v39  ;;  %v1031_v49 = vmul.f32 %v2447_v52, %v2757_v2 }
  0xc9   : > { %v1667_v16 = vmax.f32 %v2702_v56, %v1635_v32  ;;  %v1410_v58 = vadd.f32 %v1378_v17, %v1342_v41  ;;  %v1568_v44 = vadd.f32 %v1236_v29, %v1062_v9  ;;  %v995_v40 = vadd.f32 %v963_v50, %v927_v13 }
  0xca   : > { %vm798_vm5 = vcmp.eq.s32.totalorder %v391_v33, 15  ;;  %v1101_v56 = vmul.f32 %v2307_v21, %v2819_v14  ;;  %v1137_v7 = vmul.f32 %v2322_v30, %v2772_v6  ;;  %v1205_v37 = vmul.f32 %v2325_v31, %v2831_v18 }
  0xcb   : > { %1699 = vst [vmem:[%s2439_s17 + $0x68] sm:$0xff] %v1667_v16  ;;  %v2897_v45 = vsel %vm798_vm5, 0.0, %v859_v57  ;;  %v1600_v54 = vadd.f32 %v1568_v44, %v1410_v58  ;;  %v1063_v48 = vadd.f32 %v1031_v49, %v995_v40  ;;  %v1275_v2 = vmul.f32 %v2336_v35, %v2890_v43  ;;  %v2947_v49 = vld [vmem:[%s2265_s6 + $0xa0] sm:$0xff] }
  0xcc   : > { %v1311_v12 = vmul.f32 %v2339_v36, %v2842_v19  ;;  %v1169_v59 = vadd.f32 %v1137_v7, %v1101_v56  ;;  %v1379_v24 = vmul.f32 %v2366_v46, %v2897_v45  ;;  %v254_v22 = vadd.s32 144, %v2271_v1 }
  0xcd   : > { %v702_v63 = vrot.slane %v2877_v5, 7  ;;  %v1636_v61 = vadd.f32 %v2370_v47, %v1600_v54  ;;  %v832_v3 = vrot.slane %v2912_v51, 1  ;;  %v928_v15 = vmul.f32 %v2415_v26, %v2794_v4 }
  0xce   : > { %v1343_v55 = vadd.f32 %v1311_v12, %v1275_v2  ;;  %v1237_v9 = vadd.f32 %v1205_v37, %v1169_v59  ;;  %v398_v8 = vand.u32 15, %v254_v22  ;;  %v964_v10 = vmul.f32 %v2420_v27, %v2737_v53 }
  0xcf   : > { %v730_v42 = vsel %vm716_vm0, %v701_v34, %v702_v63  ;;  %v1668_v17 = vmax.f32 %v2737_v53, %v1636_v61  ;;  %v2927_v32 = vsel %vm845_vm1, %v831_v39, %v832_v3  ;;  %v1032_v13 = vmul.f32 %v2447_v52, %v2787_v0 }
  0xd0   : > { %v1411_v25 = vadd.f32 %v1379_v24, %v1343_v55  ;;  %v1569_v4 = vadd.f32 %v1237_v9, %v1063_v48  ;;  %vm670_vm6 = vcmp.eq.s32.totalorder %v398_v8, 0  ;;  %v996_v29 = vadd.f32 %v964_v10, %v928_v15 }
  0xd1   : > { %v1102_v34 = vmul.f32 %v2307_v21, %v2868_v38  ;;  %1700 = vst [vmem:[%s2439_s17 + $0x70] sm:$0xff] %v1668_v17  ;;  %v2934_v41 = vsel %vm670_vm6, 0.0, %v730_v42  ;;  %v1138_v53 = vmul.f32 %v2322_v30, %v2807_v60  ;;  %v1206_v33 = vmul.f32 %v2325_v31, %v2856_v62 }
  0xd2   : > { %v1312_v39 = vmul.f32 %v2339_v36, %v2877_v5  ;;  %v1601_v50 = vadd.f32 %v1569_v4, %v1411_v25  ;;  %v1064_v0 = vadd.f32 %v1032_v13, %v996_v29  ;;  %v1276_v16 = vmul.f32 %v2336_v35, %v2934_v41  ;;  %v2982_v13 = vld [vmem:[%s2265_s6 + $0xa8] sm:$0xff] }
  0xd3   : > { %v1380_v57 = vmul.f32 %v2366_v46, %v2927_v32  ;;  %v1170_v58 = vadd.f32 %v1138_v53, %v1102_v34  ;;  %v255_v44 = vadd.s32 152, %v2271_v1  ;;  %v703_v40 = vrot.slane %v2912_v51, 7 }
  0xd4   : > { %v833_v56 = vrot.slane %v2947_v49, 1  ;;  %v1637_v7 = vadd.f32 %v2370_v47, %v1601_v50  ;;  %v1344_v37 = vadd.f32 %v1312_v39, %v1276_v16  ;;  %v929_v54 = vmul.f32 %v2415_v26, %v2819_v14 }
  0xd5   : > { %v965_v48 = vmul.f32 %v2420_v27, %v2772_v6  ;;  %v1238_v2 = vadd.f32 %v1206_v33, %v1170_v58  ;;  %v405_v12 = vand.u32 15, %v255_v44  ;;  %v2959_v59 = vsel %vm716_vm0, %v702_v63, %v703_v40 }
  0xd6   : > { %v857_v24 = vsel %vm845_vm1, %v832_v3, %v833_v56  ;;  %v1669_v22 = vmax.f32 %v2772_v6, %v1637_v7  ;;  %v1412_v61 = vadd.f32 %v1380_v57, %v1344_v37  ;;  %v1033_v14 = vmul.f32 %v2447_v52, %v2831_v18 }
  0xd7   : > { %v997_v55 = vadd.f32 %v965_v48, %v929_v54  ;;  %v1570_v15 = vadd.f32 %v1238_v2, %v1064_v0  ;;  %vm800_vm7 = vcmp.eq.s32.totalorder %v405_v12, 15  ;;  %v1103_v9 = vmul.f32 %v2307_v21, %v2890_v43 }
  0xd8   : > { %v1139_v63 = vmul.f32 %v2322_v30, %v2842_v19  ;;  %1701 = vst [vmem:[%s2439_s17 + $0x78] sm:$0xff] %v1669_v22  ;;  %v2971_v8 = vsel %vm800_vm7, 0.0, %v857_v24  ;;  %v1207_v6 = vmul.f32 %v2325_v31, %v2897_v45  ;;  %v1277_v42 = vmul.f32 %v2336_v35, %v2959_v59 }
  0xd9   : > { %v1065_v3 = vadd.f32 %v1033_v14, %v997_v55  ;;  %v1602_v10 = vadd.f32 %v1570_v15, %v1412_v61  ;;  %v1313_v17 = vmul.f32 %v2339_v36, %v2912_v51  ;;  %v1381_v25 = vmul.f32 %v2366_v46, %v2971_v8  ;;  %v3017_v55 = vld [vmem:[%s2265_s6 + $0xb0] sm:$0xff] }
  0xda   : > { %v1171_v18 = vadd.f32 %v1139_v63, %v1103_v9  ;;  %v256_v4 = vadd.s32 160, %v2271_v1  ;;  %v704_v29 = vrot.slane %v2947_v49, 7  ;;  %v834_v34 = vrot.slane %v2982_v13, 1 }
  0xdb   : > { %v930_v53 = vmul.f32 %v2415_v26, %v2868_v38  ;;  %v1638_v33 = vadd.f32 %v2370_v47, %v1602_v10  ;;  %v1345_v50 = vadd.f32 %v1313_v17, %v1277_v42  ;;  %v966_v0 = vmul.f32 %v2420_v27, %v2807_v60 }
  0xdc   : > { %v1239_v39 = vadd.f32 %v1207_v6, %v1171_v18  ;;  %v412_v16 = vand.u32 15, %v256_v4  ;;  %v728_v57 = vsel %vm716_vm0, %v703_v40, %v704_v29  ;;  %v2996_v58 = vsel %vm845_vm1, %v833_v56, %v834_v34 }
  0xdd   : > { %v1034_v44 = vmul.f32 %v2447_v52, %v2856_v62  ;;  %v1670_v38 = vmax.f32 %v2807_v60, %v1638_v33  ;;  %v1413_v7 = vadd.f32 %v1381_v25, %v1345_v50  ;;  %v998_v54 = vadd.f32 %v966_v0, %v930_v53 }
  0xde   : > { %v1571_v37 = vadd.f32 %v1239_v39, %v1065_v3  ;;  %vm672_vm8 = vcmp.eq.s32.totalorder %v412_v16, 0  ;;  %v1104_v48 = vmul.f32 %v2307_v21, %v2934_v41  ;;  %v1140_v40 = vmul.f32 %v2322_v30, %v2877_v5 }
  0xdf   : > { %v1208_v56 = vmul.f32 %v2325_v31, %v2927_v32  ;;  %1702 = vst [vmem:[%s2439_s17 + $0x80] sm:$0xff] %v1670_v38  ;;  %v3008_v12 = vsel %vm672_vm8, 0.0, %v728_v57  ;;  %v1066_v62 = vadd.f32 %v1034_v44, %v998_v54  ;;  %v1314_v60 = vmul.f32 %v2339_v36, %v2947_v49 }
  0xe0   : > { %v1603_v2 = vadd.f32 %v1571_v37, %v1413_v7  ;;  %v1172_v24 = vadd.f32 %v1140_v40, %v1104_v48  ;;  %v1278_v22 = vmul.f32 %v2336_v35, %v3008_v12  ;;  %v1382_v61 = vmul.f32 %v2366_v46, %v2996_v58  ;;  %v3052_v7 = vld [vmem:[%s2265_s6 + $0xb8] sm:$0xff] }
  0xe1   : > { %v257_v14 = vadd.s32 168, %v2271_v1  ;;  %v705_v9 = vrot.slane %v2982_v13, 7  ;;  %v835_v63 = vrot.slane %v3017_v55, 1  ;;  %v931_v3 = vmul.f32 %v2415_v26, %v2890_v43 }
  0xe2   : > { %v1639_v15 = vadd.f32 %v2370_v47, %v1603_v2  ;;  %v1240_v6 = vadd.f32 %v1208_v56, %v1172_v24  ;;  %v1346_v42 = vadd.f32 %v1314_v60, %v1278_v22  ;;  %v967_v18 = vmul.f32 %v2420_v27, %v2842_v19 }
  0xe3   : > { %v419_v10 = vand.u32 15, %v257_v14  ;;  %v3030_v25 = vsel %vm716_vm0, %v704_v29, %v705_v9  ;;  %v855_v4 = vsel %vm845_vm1, %v834_v34, %v835_v63  ;;  %v1035_v53 = vmul.f32 %v2447_v52, %v2897_v45 }
  0xe4   : > { %v1671_v17 = vmax.f32 %v2842_v19, %v1639_v15  ;;  %v1414_v43 = vadd.f32 %v1382_v61, %v1346_v42  ;;  %v1572_v33 = vadd.f32 %v1240_v6, %v1066_v62  ;;  %v999_v39 = vadd.f32 %v967_v18, %v931_v3 }
  0xe5   : > { %vm802_vm9 = vcmp.eq.s32.totalorder %v419_v10, 15  ;;  %v1105_v19 = vmul.f32 %v2307_v21, %v2959_v59  ;;  %v1141_v29 = vmul.f32 %v2322_v30, %v2912_v51  ;;  %v1209_v34 = vmul.f32 %v2325_v31, %v2971_v8 }
  0xe6   : > { %1703 = vst [vmem:[%s2439_s17 + $0x88] sm:$0xff] %v1671_v17  ;;  %v3037_v50 = vsel %vm802_vm9, 0.0, %v855_v4  ;;  %v1604_v0 = vadd.f32 %v1572_v33, %v1414_v43  ;;  %v1067_v16 = vadd.f32 %v1035_v53, %v999_v39  ;;  %v1279_v45 = vmul.f32 %v2336_v35, %v3030_v25  ;;  %v3087_v53 = vld [vmem:[%s2265_s6 + $0xc0] sm:$0xff] }
  0xe7   : > { %v1315_v57 = vmul.f32 %v2339_v36, %v2982_v13  ;;  %v1173_v44 = vadd.f32 %v1141_v29, %v1105_v19  ;;  %v1383_v38 = vmul.f32 %v2366_v46, %v3037_v50  ;;  %v258_v37 = vadd.s32 176, %v2271_v1 }
  0xe8   : > { %v706_v54 = vrot.slane %v3017_v55, 7  ;;  %v1640_v48 = vadd.f32 %v2370_v47, %v1604_v0  ;;  %v836_v56 = vrot.slane %v3052_v7, 1  ;;  %v932_v2 = vmul.f32 %v2415_v26, %v2934_v41 }
  0xe9   : > { %v1347_v40 = vadd.f32 %v1315_v57, %v1279_v45  ;;  %v1241_v62 = vadd.f32 %v1209_v34, %v1173_v44  ;;  %v426_v60 = vand.u32 15, %v258_v37  ;;  %v968_v22 = vmul.f32 %v2420_v27, %v2877_v5 }
  0xea   : > { %v726_v24 = vsel %vm716_vm0, %v705_v9, %v706_v54  ;;  %v1672_v61 = vmax.f32 %v2877_v5, %v1640_v48  ;;  %v3067_v15 = vsel %vm845_vm1, %v835_v63, %v836_v56  ;;  %v1036_v3 = vmul.f32 %v2447_v52, %v2927_v32 }
  0xeb   : > { %v1415_v14 = vadd.f32 %v1383_v38, %v1347_v40  ;;  %v1573_v41 = vadd.f32 %v1241_v62, %v1067_v16  ;;  %vm674_vm10 = vcmp.eq.s32.totalorder %v426_v60, 0  ;;  %v1000_v6 = vadd.f32 %v968_v22, %v932_v2 }
  0xec   : > { %v1106_v9 = vmul.f32 %v2307_v21, %v3008_v12  ;;  %1704 = vst [vmem:[%s2439_s17 + $0x90] sm:$0xff] %v1672_v61  ;;  %v3074_v42 = vsel %vm674_vm10, 0.0, %v726_v24  ;;  %v1142_v5 = vmul.f32 %v2322_v30, %v2947_v49  ;;  %v1210_v10 = vmul.f32 %v2325_v31, %v2996_v58 }
  0xed   : > { %v1316_v63 = vmul.f32 %v2339_v36, %v3017_v55  ;;  %v1605_v18 = vadd.f32 %v1573_v41, %v1415_v14  ;;  %v1068_v32 = vadd.f32 %v1036_v3, %v1000_v6  ;;  %v1280_v17 = vmul.f32 %v2336_v35, %v3074_v42  ;;  %v3122_v3 = vld [vmem:[%s2265_s6 + $0xc8] sm:$0xff] }
  0xee   : > { %v1384_v4 = vmul.f32 %v2366_v46, %v3067_v15  ;;  %v1174_v43 = vadd.f32 %v1142_v5, %v1106_v9  ;;  %v259_v33 = vadd.s32 184, %v2271_v1  ;;  %v707_v39 = vrot.slane %v3052_v7, 7 }
  0xef   : > { %v837_v19 = vrot.slane %v3087_v53, 1  ;;  %v1641_v29 = vadd.f32 %v2370_v47, %v1605_v18  ;;  %v1348_v34 = vadd.f32 %v1316_v63, %v1280_v17  ;;  %v933_v0 = vmul.f32 %v2415_v26, %v2959_v59 }
  0xf0   : > { %v969_v16 = vmul.f32 %v2420_v27, %v2912_v51  ;;  %v1242_v45 = vadd.f32 %v1210_v10, %v1174_v43  ;;  %v433_v57 = vand.u32 15, %v259_v33  ;;  %v3099_v44 = vsel %vm716_vm0, %v706_v54, %v707_v39 }
  0xf1   : > { %v853_v38 = vsel %vm845_vm1, %v836_v56, %v837_v19  ;;  %v1673_v37 = vmax.f32 %v2912_v51, %v1641_v29  ;;  %v1416_v48 = vadd.f32 %v1384_v4, %v1348_v34  ;;  %v1037_v59 = vmul.f32 %v2447_v52, %v2971_v8 }
  0xf2   : > { %v1001_v40 = vadd.f32 %v969_v16, %v933_v0  ;;  %v1574_v2 = vadd.f32 %v1242_v45, %v1068_v32  ;;  %vm804_vm11 = vcmp.eq.s32.totalorder %v433_v57, 15  ;;  %v1107_v62 = vmul.f32 %v2307_v21, %v3030_v25 }
  0xf3   : > { %v1143_v54 = vmul.f32 %v2322_v30, %v2982_v13  ;;  %1705 = vst [vmem:[%s2439_s17 + $0x98] sm:$0xff] %v1673_v37  ;;  %v3111_v60 = vsel %vm804_vm11, 0.0, %v853_v38  ;;  %v1211_v51 = vmul.f32 %v2325_v31, %v3037_v50  ;;  %v1281_v24 = vmul.f32 %v2336_v35, %v3099_v44 }
  0xf4   : > { %v1069_v56 = vadd.f32 %v1037_v59, %v1001_v40  ;;  %v1606_v22 = vadd.f32 %v1574_v2, %v1416_v48  ;;  %v1317_v61 = vmul.f32 %v2339_v36, %v3052_v7  ;;  %v1385_v14 = vmul.f32 %v2366_v46, %v3111_v60  ;;  %v3157_v40 = vld [vmem:[%s2265_s6 + $0xd0] sm:$0xff] }
  0xf5   : > { %v1175_v8 = vadd.f32 %v1143_v54, %v1107_v62  ;;  %v260_v41 = vadd.s32 192, %v2271_v1  ;;  %v708_v6 = vrot.slane %v3087_v53, 7  ;;  %v838_v9 = vrot.slane %v3122_v3, 1 }
  0xf6   : > { %v934_v5 = vmul.f32 %v2415_v26, %v3008_v12  ;;  %v1642_v10 = vadd.f32 %v2370_v47, %v1606_v22  ;;  %v1349_v18 = vadd.f32 %v1317_v61, %v1281_v24  ;;  %v970_v32 = vmul.f32 %v2420_v27, %v2947_v49 }
  0xf7   : > { %v1243_v63 = vadd.f32 %v1211_v51, %v1175_v8  ;;  %v440_v17 = vand.u32 15, %v260_v41  ;;  %v724_v4 = vsel %vm716_vm0, %v707_v39, %v708_v6  ;;  %v3136_v43 = vsel %vm845_vm1, %v837_v19, %v838_v9 }
  0xf8   : > { %v1038_v33 = vmul.f32 %v2447_v52, %v2996_v58  ;;  %v1674_v12 = vmax.f32 %v2947_v49, %v1642_v10  ;;  %v1417_v29 = vadd.f32 %v1385_v14, %v1349_v18  ;;  %v1002_v0 = vadd.f32 %v970_v32, %v934_v5 }
  0xf9   : > { %v1575_v34 = vadd.f32 %v1243_v63, %v1069_v56  ;;  %vm676_vm12 = vcmp.eq.s32.totalorder %v440_v17, 0  ;;  %v1108_v16 = vmul.f32 %v2307_v21, %v3074_v42  ;;  %v1144_v39 = vmul.f32 %v2322_v30, %v3017_v55 }
  0xfa   : > { %v1212_v19 = vmul.f32 %v2325_v31, %v3067_v15  ;;  %1706 = vst [vmem:[%s2439_s17 + $0xa0] sm:$0xff] %v1674_v12  ;;  %v3148_v57 = vsel %vm676_vm12, 0.0, %v724_v4  ;;  %v1070_v58 = vadd.f32 %v1038_v33, %v1002_v0  ;;  %v1318_v49 = vmul.f32 %v2339_v36, %v3087_v53 }
  0xfb   : > { %v1607_v45 = vadd.f32 %v1575_v34, %v1417_v29  ;;  %v1176_v38 = vadd.f32 %v1144_v39, %v1108_v16  ;;  %v1282_v37 = vmul.f32 %v2336_v35, %v3148_v57  ;;  %v1386_v48 = vmul.f32 %v2366_v46, %v3136_v43  ;;  %v3192_v29 = vld [vmem:[%s2265_s6 + $0xd8] sm:$0xff] }
  0xfc   : > { %v261_v59 = vadd.s32 200, %v2271_v1  ;;  %v709_v62 = vrot.slane %v3122_v3, 7  ;;  %v839_v54 = vrot.slane %v3157_v40, 1  ;;  %v935_v56 = vmul.f32 %v2415_v26, %v3030_v25 }
  0xfd   : > { %v1643_v2 = vadd.f32 %v2370_v47, %v1607_v45  ;;  %v1244_v51 = vadd.f32 %v1212_v19, %v1176_v38  ;;  %v1350_v24 = vadd.f32 %v1318_v49, %v1282_v37  ;;  %v971_v8 = vmul.f32 %v2420_v27, %v2982_v13 }
  0xfe   : > { %v447_v22 = vand.u32 15, %v261_v59  ;;  %v3170_v14 = vsel %vm716_vm0, %v708_v6, %v709_v62  ;;  %v851_v41 = vsel %vm845_vm1, %v838_v9, %v839_v54  ;;  %v1039_v5 = vmul.f32 %v2447_v52, %v3037_v50 }
  0xff   : > { %v1675_v61 = vmax.f32 %v2982_v13, %v1643_v2  ;;  %v1418_v25 = vadd.f32 %v1386_v48, %v1350_v24  ;;  %v1576_v10 = vadd.f32 %v1244_v51, %v1070_v58  ;;  %v1003_v63 = vadd.f32 %v971_v8, %v935_v56 }
 0x100   : > { %vm806_vm13 = vcmp.eq.s32.totalorder %v447_v22, 15  ;;  %v1109_v13 = vmul.f32 %v2307_v21, %v3099_v44  ;;  %v1145_v6 = vmul.f32 %v2322_v30, %v3052_v7  ;;  %v1213_v9 = vmul.f32 %v2325_v31, %v3111_v60 }
 0x101   : > { %1707 = vst [vmem:[%s2439_s17 + $0xa8] sm:$0xff] %v1675_v61  ;;  %v3177_v18 = vsel %vm806_vm13, 0.0, %v851_v41  ;;  %v1608_v32 = vadd.f32 %v1576_v10, %v1418_v25  ;;  %v1071_v17 = vadd.f32 %v1039_v5, %v1003_v63  ;;  %v1283_v50 = vmul.f32 %v2336_v35, %v3170_v14  ;;  %v3227_v5 = vld [vmem:[%s2265_s6 + $0xe0] sm:$0xff] }
 0x102   : > { %v1319_v4 = vmul.f32 %v2339_v36, %v3122_v3  ;;  %v1177_v33 = vadd.f32 %v1145_v6, %v1109_v13  ;;  %v1387_v12 = vmul.f32 %v2366_v46, %v3177_v18  ;;  %v262_v34 = vadd.s32 208, %v2271_v1 }
 0x103   : > { %v710_v0 = vrot.slane %v3157_v40, 7  ;;  %v1644_v16 = vadd.f32 %v2370_v47, %v1608_v32  ;;  %v840_v19 = vrot.slane %v3192_v29, 1  ;;  %v936_v45 = vmul.f32 %v2415_v26, %v3074_v42 }
 0x104   : > { %v1351_v39 = vadd.f32 %v1319_v4, %v1283_v50  ;;  %v1245_v58 = vadd.f32 %v1213_v9, %v1177_v33  ;;  %v454_v49 = vand.u32 15, %v262_v34  ;;  %v972_v37 = vmul.f32 %v2420_v27, %v3017_v55 }
 0x105   : > { %v722_v38 = vsel %vm716_vm0, %v709_v62, %v710_v0  ;;  %v1676_v48 = vmax.f32 %v3017_v55, %v1644_v16  ;;  %v3207_v2 = vsel %vm845_vm1, %v839_v54, %v840_v19  ;;  %v1040_v56 = vmul.f32 %v2447_v52, %v3067_v15 }
 0x106   : > { %v1419_v59 = vadd.f32 %v1387_v12, %v1351_v39  ;;  %v1577_v42 = vadd.f32 %v1245_v58, %v1071_v17  ;;  %vm678_vm14 = vcmp.eq.s32.totalorder %v454_v49, 0  ;;  %v1004_v51 = vadd.f32 %v972_v37, %v936_v45 }
 0x107   : > { %v1110_v62 = vmul.f32 %v2307_v21, %v3148_v57  ;;  %1708 = vst [vmem:[%s2439_s17 + $0xb0] sm:$0xff] %v1676_v48  ;;  %v3214_v24 = vsel %vm678_vm14, 0.0, %v722_v38  ;;  %v1146_v55 = vmul.f32 %v2322_v30, %v3087_v53  ;;  %v1214_v22 = vmul.f32 %v2325_v31, %v3136_v43 }
 0x108   : > { %v1320_v54 = vmul.f32 %v2339_v36, %v3157_v40  ;;  %v1609_v8 = vadd.f32 %v1577_v42, %v1419_v59  ;;  %v1072_v15 = vadd.f32 %v1040_v56, %v1004_v51  ;;  %v1284_v61 = vmul.f32 %v2336_v35, %v3214_v24 }
 0x109   : > { %v1388_v41 = vmul.f32 %v2366_v46, %v3207_v2  ;;  %v1178_v25 = vadd.f32 %v1146_v55, %v1110_v62  ;;  %v263_v10 = vadd.s32 216, %v2271_v1  ;;  %v711_v63 = vrot.slane %v3192_v29, 7 }
 0x10a   : > { %v841_v13 = vrot.slane %v3227_v5, 1  ;;  %v1645_v6 = vadd.f32 %v2370_v47, %v1609_v8  ;;  %v1352_v9 = vadd.f32 %v1320_v54, %v1284_v61  ;;  %v937_v32 = vmul.f32 %v2415_v26, %v3099_v44 }
 0x10b   : > { %v973_v17 = vmul.f32 %v2420_v27, %v3052_v7  ;;  %v1246_v50 = vadd.f32 %v1214_v22, %v1178_v25  ;;  %v461_v4 = vand.u32 15, %v263_v10  ;;  %v3239_v33 = vsel %vm716_vm0, %v710_v0, %v711_v63  ;;  %v3251_v0 = vld [vmem:[%s2265_s6 + $0xe8] sm:$0xff] }
 0x10c   : > { %v849_v12 = vsel %vm845_vm1, %v840_v19, %v841_v13  ;;  %v1677_v34 = vmax.f32 %v3052_v7, %v1645_v6  ;;  %v1420_v16 = vadd.f32 %v1388_v41, %v1352_v9  ;;  %v1041_v45 = vmul.f32 %v2447_v52, %v3111_v60 }
 0x10d   : > { %v1005_v39 = vadd.f32 %v973_v17, %v937_v32  ;;  %v1578_v44 = vadd.f32 %v1246_v50, %v1072_v15  ;;  %vm808_vm15 = vcmp.eq.s32.totalorder %v461_v4, 15  ;;  %v1111_v58 = vmul.f32 %v2307_v21, %v3170_v14 }
 0x10e   : > { %v1147_v49 = vmul.f32 %v2322_v30, %v3122_v3  ;;  %1709 = vst [vmem:[%s2439_s17 + $0xb8] sm:$0xff] %v1677_v34  ;;  %v3254_v38 = vsel %vm808_vm15, 0.0, %v849_v12  ;;  %v1215_v7 = vmul.f32 %v2325_v31, %v3177_v18  ;;  %v1285_v60 = vmul.f32 %v2336_v35, %v3239_v33 }
 0x10f   : > { %v1073_v19 = vadd.f32 %v1041_v45, %v1005_v39  ;;  %v1610_v37 = vadd.f32 %v1578_v44, %v1420_v16  ;;  %v1321_v59 = vmul.f32 %v2339_v36, %v3192_v29  ;;  %v1389_v56 = vmul.f32 %v2366_v46, %v3254_v38 }
 0x110   : > { %v1179_v48 = vadd.f32 %v1147_v49, %v1111_v58  ;;  %v264_v42 = vadd.s32 224, %v2271_v1  ;;  %v712_v51 = vrot.slane %v3227_v5, 7  ;;  %v842_v62 = vrot.slane %v3251_v0, 1 }
 0x111   : > { %v938_v55 = vmul.f32 %v2415_v26, %v3148_v57  ;;  %v1646_v22 = vadd.f32 %v2370_v47, %v1610_v37  ;;  %v1353_v8 = vadd.f32 %v1321_v59, %v1285_v60  ;;  %v974_v15 = vmul.f32 %v2420_v27, %v3087_v53 }
 0x112   : > { %v1247_v54 = vadd.f32 %v1215_v7, %v1179_v48  ;;  %v468_v61 = vand.u32 15, %v264_v42  ;;  %v720_v41 = vsel %vm716_vm0, %v711_v63, %v712_v51  ;;  %v3276_v25 = vsel %vm845_vm1, %v841_v13, %v842_v62  ;;  %v3288_v13 = vld [vmem:[%s2265_s6 + $0xf0] sm:$0xff] }
 0x113   : > { %v1042_v57 = vmul.f32 %v2447_v52, %v3136_v43  ;;  %v1678_v10 = vmax.f32 %v3087_v53, %v1646_v22  ;;  %v1421_v6 = vadd.f32 %v1389_v56, %v1353_v8  ;;  %v1006_v32 = vadd.f32 %v974_v15, %v938_v55 }
 0x114   : > { %v1579_v9 = vadd.f32 %v1247_v54, %v1073_v19  ;;  %vm680_vm2 = vcmp.eq.s32.totalorder %v468_v61, 0  ;;  %v1112_v17 = vmul.f32 %v2307_v21, %v3214_v24  ;;  %v1148_v50 = vmul.f32 %v2322_v30, %v3157_v40 }
 0x115   : > { %v1216_v63 = vmul.f32 %v2325_v31, %v3207_v2  ;;  %1710 = vst [vmem:[%s2439_s17 + $0xc0] sm:$0xff] %v1678_v10  ;;  %v3291_v43 = vsel %vm680_vm2, 0.0, %v720_v41  ;;  %v1074_v53 = vadd.f32 %v1042_v57, %v1006_v32  ;;  %v1322_v12 = vmul.f32 %v2339_v36, %v3227_v5 }
 0x116   : > { %v1611_v4 = vadd.f32 %v1579_v9, %v1421_v6  ;;  %v1180_v34 = vadd.f32 %v1148_v50, %v1112_v17  ;;  %v1286_v16 = vmul.f32 %v2336_v35, %v3291_v43  ;;  %v1390_v39 = vmul.f32 %v2366_v46, %v3276_v25  ;;  %v3335_v50 = vld [vmem:[%s2265_s6 + $0xf8] sm:$0xff] }
 0x117   : > { %v265_v45 = vadd.s32 232, %v2271_v1  ;;  %v713_v58 = vrot.slane %v3251_v0, 7  ;;  %v843_v49 = vrot.slane %v3288_v13, 1  ;;  %v939_v19 = vmul.f32 %v2415_v26, %v3170_v14 }
 0x118   : > { %v1647_v44 = vadd.f32 %v2370_v47, %v1611_v4  ;;  %v1248_v7 = vadd.f32 %v1216_v63, %v1180_v34  ;;  %v1354_v60 = vadd.f32 %v1322_v12, %v1286_v16  ;;  %v975_v48 = vmul.f32 %v2420_v27, %v3122_v3 }
 0x119   : > { %v475_v37 = vand.u32 15, %v265_v45  ;;  %v3310_v56 = vsel %vm716_vm0, %v712_v51, %v713_v58  ;;  %v847_v42 = vsel %vm845_vm1, %v842_v62, %v843_v49  ;;  %v1043_v55 = vmul.f32 %v2447_v52, %v3177_v18 }
 0x11a   : > { %v1679_v59 = vmax.f32 %v3122_v3, %v1647_v44  ;;  %v1422_v22 = vadd.f32 %v1390_v39, %v1354_v60  ;;  %v1580_v14 = vadd.f32 %v1248_v7, %v1074_v53  ;;  %v1007_v54 = vadd.f32 %v975_v48, %v939_v19 }
 0x11b   : > { %vm810_vm3 = vcmp.eq.s32.totalorder %v475_v37, 15  ;;  %v1113_v3 = vmul.f32 %v2307_v21, %v3239_v33  ;;  %v1149_v51 = vmul.f32 %v2322_v30, %v3192_v29  ;;  %v1217_v62 = vmul.f32 %v2325_v31, %v3254_v38 }
 0x11c   : > { %1711 = vst [vmem:[%s2439_s17 + $0xc8] sm:$0xff] %v1679_v59  ;;  %v3317_v8 = vsel %vm810_vm3, 0.0, %v847_v42  ;;  %v1612_v15 = vadd.f32 %v1580_v14, %v1422_v22  ;;  %v1075_v61 = vadd.f32 %v1043_v55, %v1007_v54  ;;  %v1287_v18 = vmul.f32 %v2336_v35, %v3310_v56 }
 0x11d   : > { %v1323_v41 = vmul.f32 %v2339_v36, %v3251_v0  ;;  %v1181_v57 = vadd.f32 %v1149_v51, %v1113_v3  ;;  %v1391_v10 = vmul.f32 %v2366_v46, %v3317_v8  ;;  %v266_v6 = vadd.s32 240, %v2271_v1 }
 0x11e   : > { %v714_v9 = vrot.slane %v3288_v13, 7  ;;  %v1648_v32 = vadd.f32 %v2370_v47, %v1612_v15  ;;  %v844_v63 = vrot.slane %v3335_v50, 1  ;;  %v940_v4 = vmul.f32 %v2415_v26, %v3214_v24 }
 0x11f   : > { %v1355_v17 = vadd.f32 %v1323_v41, %v1287_v18  ;;  %v1249_v53 = vadd.f32 %v1217_v62, %v1181_v57  ;;  %v482_v12 = vand.u32 15, %v266_v6  ;;  %v976_v16 = vmul.f32 %v2420_v27, %v3157_v40 }
 0x120   : > { %v718_v34 = vsel %vm716_vm0, %v713_v58, %v714_v9  ;;  %v1680_v39 = vmax.f32 %v3157_v40, %v1648_v32  ;;  %v846_v44 = vsel %vm845_vm1, %v843_v49, %v844_v63  ;;  %v1044_v19 = vmul.f32 %v2447_v52, %v3207_v2 }
 0x121   : > { %v1423_v45 = vadd.f32 %v1391_v10, %v1355_v17  ;;  %v1581_v7 = vadd.f32 %v1249_v53, %v1075_v61  ;;  %vm682_vm4 = vcmp.eq.s32.totalorder %v482_v12, 0  ;;  %v1008_v24 = vadd.f32 %v976_v16, %v940_v4 }
 0x122   : > { %v1114_v60 = vmul.f32 %v2307_v21, %v3291_v43  ;;  %1712 = vst [vmem:[%s2439_s17 + $0xd0] sm:$0xff] %v1680_v39  ;;  %v779_v58 = vsel %vm682_vm4, 0.0, %v718_v34  ;;  %v1150_v37 = vmul.f32 %v2322_v30, %v3227_v5  ;;  %v1218_v40 = vmul.f32 %v2325_v31, %v3276_v25 }
 0x123   : > { %v1324_v49 = vmul.f32 %v2339_v36, %v3288_v13  ;;  %v1613_v48 = vadd.f32 %v1581_v7, %v1423_v45  ;;  %v1076_v59 = vadd.f32 %v1044_v19, %v1008_v24  ;;  %v1288_v2 = vmul.f32 %v2336_v35, %v779_v58 }
 0x124   : > { %v1392_v42 = vmul.f32 %v2366_v46, %v846_v44  ;;  %v1182_v55 = vadd.f32 %v1150_v37, %v1114_v60  ;;  %v267_v22 = vadd.s32 248, %v2271_v1  ;;  %v717_v14 = vsel %vm716_vm0, %v714_v9, %v715_v28 }
 0x125   : > { %v877_v54 = vsel %vm845_vm1, %v844_v63, %v813_v20  ;;  %v1649_v3 = vadd.f32 %v2370_v47, %v1613_v48  ;;  %v1356_v51 = vadd.f32 %v1324_v49, %v1288_v2  ;;  %v941_v62 = vmul.f32 %v2415_v26, %v3239_v33 }
 0x126   : > { %v977_v15 = vmul.f32 %v2420_v27, %v3192_v29  ;;  %v1250_v61 = vadd.f32 %v1218_v40, %v1182_v55  ;;  %v489_v23 = vand.u32 15, %v267_v22  ;;  %v1045_v28 = vmul.f32 %v2447_v52, %v3254_v38 }
 0x127   : > { %v1115_v11 = vmul.f32 %v2307_v21, %v3310_v56  ;;  %v1681_v1 = vmax.f32 %v3192_v29, %v1649_v3  ;;  %v1424_v20 = vadd.f32 %v1392_v42, %v1356_v51  ;;  %v1151_v41 = vmul.f32 %v2322_v30, %v3251_v0 }
 0x128   : > { %v1009_v18 = vadd.f32 %v977_v15, %v941_v62  ;;  %v1582_v57 = vadd.f32 %v1250_v61, %v1076_v59  ;;  %vm812_vm0 = vcmp.eq.s32.totalorder %v489_v23, 15  ;;  %v1219_v33 = vmul.f32 %v2325_v31, %v3317_v8 }
 0x129   : > { %v1289_v10 = vmul.f32 %v2336_v35, %v717_v14  ;;  %1713 = vst [vmem:[%s2439_s17 + $0xd8] sm:$0xff] %v1681_v1  ;;  %v909_v6 = vsel %vm812_vm0, 0.0, %v877_v54  ;;  %v1183_v9 = vadd.f32 %v1151_v41, %v1115_v11  ;;  %v1325_v32 = vmul.f32 %v3335_v50, %v2339_v36 }
 0x12a   : > { %v1077_v38 = vadd.f32 %v1045_v28, %v1009_v18  ;;  %v1614_v29 = vadd.f32 %v1582_v57, %v1424_v20  ;;  %v1393_v17 = vmul.f32 %v2366_v46, %v909_v6  ;;  %v942_v63 = vmul.f32 %v2415_v26, %v3291_v43 }
 0x12b   : > { %v978_v4 = vmul.f32 %v2420_v27, %v3227_v5  ;;  %v1251_v53 = vadd.f32 %v1219_v33, %v1183_v9  ;;  %v1357_v12 = vadd.f32 %v1325_v32, %v1289_v10  ;;  %v1046_v35 = vmul.f32 %v2447_v52, %v3276_v25 }
 0x12c   : > { %v1116_v34 = vmul.f32 %v2307_v21, %v779_v58  ;;  %v1650_v16 = vadd.f32 %v2370_v47, %v1614_v29  ;;  %v1152_v46 = vmul.f32 %v2322_v30, %v3288_v13  ;;  %v1220_v39 = vmul.f32 %v2325_v31, %v846_v44 }
 0x12d   : > { %v1010_v36 = vadd.f32 %v978_v4, %v942_v63  ;;  %v1425_v43 = vadd.f32 %v1393_v17, %v1357_v12  ;;  %v1583_v45 = vadd.f32 %v1251_v53, %v1077_v38  ;;  %v943_v19 = vmul.f32 %v2415_v26, %v3310_v56 }
 0x12e   : > { %v979_v7 = vmul.f32 %v2420_v27, %v3251_v0  ;;  %v1682_v25 = vmax.f32 %v3227_v5, %v1650_v16  ;;  %v1184_v60 = vadd.f32 %v1152_v46, %v1116_v34  ;;  %v1047_v58 = vmul.f32 %v2447_v52, %v3317_v8 }
 0x12f   : > { %v1078_v24 = vadd.f32 %v1046_v35, %v1010_v36  ;;  %v1615_v37 = vadd.f32 %v1583_v45, %v1425_v43  ;;  %v1117_v44 = vmul.f32 %v2307_v21, %v717_v14  ;;  %v1153_v26 = vmul.f32 %v3335_v50, %v2322_v30 }
 0x130   : > { %v1011_v40 = vadd.f32 %v979_v7, %v943_v19  ;;  %1714 = vst [vmem:[%s2439_s17 + $0xe0] sm:$0xff] %v1682_v25  ;;  %v1252_v27 = vadd.f32 %v1220_v39, %v1184_v60  ;;  %v1221_v5 = vmul.f32 %v2325_v31, %v909_v6 }
 0x131   : > { %v1651_v56 = vadd.f32 %v2370_v47, %v1615_v37  ;;  %v1185_v48 = vadd.f32 %v1153_v26, %v1117_v44 }
 0x132   : > { %v1079_v49 = vadd.f32 %v1047_v58, %v1011_v40  ;;  %v1584_v52 = vadd.f32 %v1252_v27, %v1078_v24 }
 0x133   : > { %v1683_v8 = vmax.f32 %v3251_v0, %v1651_v56  ;;  %v1253_v59 = vadd.f32 %v1221_v5, %v1185_v48 }
 0x134   : > { %v1652_v21 = vadd.f32 %v2370_v47, %v1584_v52 }
 0x135   : > { %1715 = vst [vmem:[%s2439_s17 + $0xe8] sm:$0xff] %v1683_v8  ;;  %v1585_v30 = vadd.f32 %v1253_v59, %v1079_v49 }
 0x136   : > { %v1684_v2 = vmax.f32 %v3288_v13, %v1652_v21 }
 0x137   : > { %v1653_v31 = vadd.f32 %v2370_v47, %v1585_v30 }
 0x138   : > { %1716 = vst [vmem:[%s2439_s17 + $0xf0] sm:$0xff] %v1684_v2 }
 0x139   : > { %v1685_v0 = vmax.f32 %v3335_v50, %v1653_v31 }
 0x13b   : > { %1717 = vst [vmem:[%s2439_s17 + $0xf8] sm:$0xff] %v1685_v0 }
 0x13c   : > { %2000 = shalt.err (!%p1997_p5)
}
 0x13d   : > { %s2001_s23 = scalar_lea.hbm %s3423_s5, 4096  ;;  %s2005_s26 = scalar_lea.hbm %s3478_s2, 8192 }
 0x13e   : > { %p2002_p9 = scmp.ne.s32.totalorder %s3423_s5, %s2001_s23  ;;  %p2006_p3 = scmp.lt.u32.totalorder %s3423_s5, %s3478_s2 }
 0x13f   : > { %p2007_p7 = scmp.lt.u32.totalorder %s2005_s26, %s2001_s23  ;;  %p2009_p4 = scmp.lt.u32.totalorder %s2001_s23, %s3423_s5 }
 0x140   : > { %p2003_p1 = pnand %p2002_p9, %p2196_p10 }
 0x141   : > { %p2008_p13 = por %p2007_p7, %p2006_p3 }
 0x142   : > { %p2004_p2 = pneg %p2003_p1 }
 0x143   : > { %p2010_p6 = por %p2009_p4, %p2008_p13 }
 0x145   : > { %p2011_p8 = pnand %p2010_p6, %p2004_p2 }
 0x147   : > { %2014 = shalt.err (!%p2011_p8)
}
 0x148   : > { %s2080_s6 = smov 128   ;;  %s2081_s17 = smov 8  }
 0x149   : > { %1857 = dma.vmem_to_hbm [thread:$0]  (%p2196_p10), %s3425_s21, 4096, %s3423_s5, %s1719_s12, %s2080_s6, %s2080_s6, %s2081_s17  }
 0x14a PF: > { %s1748_s19 = sand.u32 1, %s2053_s9   ;;  %p3500_p12 = scmp.ne.s32.totalorder %s3486_s20, 0 }
 0x14b   : > { %p3501_p11 = scmp.ge.s32.totalorder %s2073_s14, 2  ;;  %s1749_s7 = scalar_lea.sflag [#allocation4], %s1748_s19 }
 0x14d   : > { %p1868_p0 = pnand %p3501_p11, %p3500_p12 }
 0x14f   : > { %2048 = dma.done.wait (!%p1868_p0), %s1749_s7, 4096  }
 0x150   : > { %2050 = vsyncadd (!%p1868_p0), %s1749_s7, 4294963200  ;;  %s19_s14 = sadd.s32 1, %s2073_s14   ;;  %s3502_s9 = smov %s2057_s10 }
 0x151   : > { %p16_p5 = scmp.ge.s32.totalorder %s19_s14, 4   ;;  %s3503_s10 = smov %s2061_s11 }
 0x152   : > { %s3504_s11 = smov %s2205_s28  ;;  %s3505_s12 = smov %s2069_s13 }
 0x153   : > { %s3506_s13 = smov %s3508_s25  ;;  %18 = sbr.rel (!%p16_p5) target bundleno = 7 (0x7), region = 79 }
 0x15a   :  { %1754 = vsyncpa [#allocation3], 1 }
 0x15b   :  { %1756 = vsyncpa [#allocation3 + $0x1], 1 }
 0x15c   :  { %1757 = vsyncpa [#allocation6], 1 }
 0x15d   :  { %1759 = vsyncpa [#allocation6 + $0x1], 1 }
 0x15e   :  { %1760 = vsyncpa [#allocation4], 1 }
 0x15f   :  { %1762 = vsyncpa [#allocation4 + $0x1], 1 }

</bundles_post_ra>
